<compile_context>
chip_gen: v6e
topology: v6e:2x2x1
jax: 0.10.0
libtpu: 0.0.40
codegen_flags: <defaults>
</compile_context>

<pallas_src>
import numpy as np

import jax
import jax.numpy as jnp
from jax import lax
from jax.experimental import pallas as pl
from jax.experimental.pallas import tpu as pltpu

WINSIZE = 90  # must be divisible by 9 (two exact MaxPool1d(3,3) stages)


def _round_up(n, m):
    return ((n + m - 1) // m) * m


# ----------------------- host-side constant-matrix builders ----------------- #
def _conv_same_matrix(w, L, Lp):
    """Block-Toeplitz M (Cout*Lp, Cin*Lp) with y_vec = M @ x_vec for a stride-1
    'same'-padded conv (pad=(K-1)//2) over length L; rows/cols >= L are zero."""
    Cout, Cin, K = w.shape
    pad = (K - 1) // 2
    M = np.zeros((Cout * Lp, Cin * Lp), np.float32)
    for k in range(K):
        off = k - pad
        lo = np.arange(max(0, -off), min(L, L - off))
        if lo.size == 0:
            continue
        li = lo + off
        for o in range(Cout):
            for c in range(Cin):
                M[o * Lp + lo, c * Lp + li] = w[o, c, k]
    return M


def _pool_phase_matrix(C, Lin, Lpin, Lout, Lpout, r):
    """0/1 selection: out[c, j] = in[c, 3*j + r]  (phase r of MaxPool1d(3,3))."""
    M = np.zeros((C * Lpout, C * Lpin), np.float32)
    j = np.arange(Lout)
    src = 3 * j + r
    for c in range(C):
        M[c * Lpout + j, c * Lpin + src] = 1.0
    return M


def _upsample_matrix(C, Lin, Lpin, Lout, Lpout, num, den):
    """0/1 selection for nearest upsample by scale num/den: src = floor(m*den/num)."""
    M = np.zeros((C * Lpout, C * Lpin), np.float32)
    m = np.arange(Lout)
    src = np.minimum((m * den) // num, Lin - 1)
    for c in range(C):
        M[c * Lpout + m, c * Lpin + src] = 1.0
    return M


def _bias_row(b, L, Lp):
    """(1, C*Lp) bias row, replicated over valid positions, zero on pad rows."""
    C = b.shape[0]
    v = np.zeros((1, C * Lp), np.float32)
    for c in range(C):
        v[0, c * Lp:c * Lp + L] = b[c]
    return v


def _tconv_as_conv(w):
    """ConvTranspose1d weight (Cin, Cout, K), stride 1, padding (K-1)//2 ->
    equivalent 'same' Conv1d weight (Cout, Cin, K)."""
    return np.transpose(w[:, :, ::-1], (1, 0, 2))


def build_constants(params, winsize, weight_dtype):
    """Precompute the six per-layer matrices (transposed for x @ W) + biases."""
    p = [np.asarray(a, np.float32) for a in params]
    w1, b1, w2, b2, w3, b3, wd1, bd1, wd2, bd2, wd3, bd3 = p

    L0 = winsize
    L1 = L0 // 3
    L2 = L1 // 3
    Lup1 = 3 * L2                       # == L1
    Lup2 = (Lup1 * 309) // 100          # floor(Lup1 * 3.09)
    P0, P1, P2, Pu2 = (_round_up(v, 8) for v in (L0, L1, L2, Lup2))

    # ---- encoder ----
    C1 = _conv_same_matrix(w1, L0, P0)                                   # (16*P0, 3*P0)
    A1 = np.concatenate([_pool_phase_matrix(16, L0, P0, L1, P1, r) @ C1
                         for r in range(3)], axis=0)                     # (3*16*P1, 3*P0)
    C2 = _conv_same_matrix(w2, L1, P1)                                   # (8*P1, 16*P1)
    A2 = np.concatenate([_pool_phase_matrix(8, L1, P1, L2, P2, r) @ C2
                         for r in range(3)], axis=0)                     # (3*8*P2, 16*P1)
    A3 = _conv_same_matrix(w3, L2, P2)                                   # (4*P2, 8*P2)

    # ---- decoder (nearest upsamples folded into the following transposed conv) ----
    D1 = _conv_same_matrix(_tconv_as_conv(wd1), L2, P2)                  # (8*P2, 4*P2)
    D2 = _conv_same_matrix(_tconv_as_conv(wd2), Lup1, P1) \
        @ _upsample_matrix(8, L2, P2, Lup1, P1, 3, 1)                    # (16*P1, 8*P2)
    D3 = _conv_same_matrix(_tconv_as_conv(wd3), Lup2, Pu2) \
        @ _upsample_matrix(16, Lup1, P1, Lup2, Pu2, 309, 100)            # (3*Pu2, 16*P1)

    mats = [A1, A2, A3, D1, D2, D3]
    biases = [_bias_row(b1, L1, P1), _bias_row(b2, L2, P2), _bias_row(b3, L2, P2),
              _bias_row(bd1, L2, P2), _bias_row(bd2, Lup1, P1), _bias_row(bd3, Lup2, Pu2)]

    consts = []
    for M, v in zip(mats, biases):
        consts.append(jnp.asarray(M.T, weight_dtype))   # (F_in, F_out) for x @ W
        consts.append(jnp.asarray(v, jnp.float32))      # (1, F_out)
    dims = dict(L0=L0, Lup2=Lup2, P0=P0, Pu2=Pu2)
    return consts, dims


# ----------------------------------- kernel --------------------------------- #
def autoencoder_kernel(x_ref,
                       a1_ref, b1_ref, a2_ref, b2_ref, a3_ref, b3_ref,
                       d1_ref, e1_ref, d2_ref, e2_ref, d3_ref, e3_ref,
                       o_ref):
    cdt = a1_ref.dtype                                   # MXU operand dtype (bf16/f32)

    def mm(h, w_ref):
        return jnp.dot(h.astype(cdt), w_ref[...],
                       preferred_element_type=jnp.float32)

    def pool3(t, w):
        # elementwise max of the three stacked pooling phases (lane-aligned slices)
        return jnp.maximum(jnp.maximum(t[:, :w], t[:, w:2 * w]), t[:, 2 * w:3 * w])

    def relu(v):
        return jnp.maximum(v, 0.0)

    x = x_ref[...]                                        # (TB, 3*P0) f32

    # ---- encoder ----
    t = mm(x, a1_ref)                                     # Conv1(3->16,k15) x 3 pool phases
    h = relu(pool3(t, b1_ref.shape[-1]) + b1_ref[...])    # MaxPool(3,3) + ReLU  -> (TB, 16*P1)
    t = mm(h, a2_ref)                                     # Conv2(16->8,k9) x 3 pool phases
    h = relu(pool3(t, b2_ref.shape[-1]) + b2_ref[...])    # ReLU/MaxPool fused    -> (TB, 8*P2)
    h = relu(mm(h, a3_ref) + b3_ref[...])                 # Conv3(8->4,k5) + ReLU -> (TB, 4*P2)

    # ---- decoder ----
    h = relu(mm(h, d1_ref) + e1_ref[...])                 # ConvT1(4->8,k5) + ReLU
    h = relu(mm(h, d2_ref) + e2_ref[...])                 # Up x3 folded into ConvT2(8->16,k9)
    o = mm(h, d3_ref) + e3_ref[...]                       # Up x3.09 folded into ConvT3(16->3,k15)

    o_ref[...] = o.astype(o_ref.dtype)                    # dense (TB, 3*Pu2) store


# ----------------------------------- wrapper -------------------------------- #
def conv_autoencoder_improved(x_flat, params, winsize=WINSIZE, batch_tile=256,
                              use_bf16=True, core_parallel=False):
    assert winsize % 9 == 0, "winsize must be divisible by 9 (two MaxPool1d(3,3) stages)"

    wdt = jnp.bfloat16 if use_bf16 else jnp.float32
    consts, dims = build_constants(params, winsize, wdt)
    L0, Lup2, P0, Pu2 = dims["L0"], dims["Lup2"], dims["P0"], dims["Pu2"]
    Fin, Fout = 3 * P0, 3 * Pu2

    B = x_flat.shape[0]
    x = jnp.asarray(x_flat, jnp.float32).reshape(B, 3, L0)
    x = jnp.pad(x, ((0, 0), (0, 0), (0, P0 - L0))).reshape(B, Fin)

    # batch tile: TB samples per grid step (multiple of 8 sublanes)
    TB = min(_round_up(max(batch_tile, 8), 8), _round_up(B, 8))
    Bpad = _round_up(B, TB)
    if Bpad != B:
        x = jnp.pad(x, ((0, Bpad - B), (0, 0)))

    grid = (Bpad // TB,)
    # core_parallel=True: shard the batch grid axis across v7x's two TensorCores
    # (keep Bpad//TB >= 2 there).  On v5e/v6e leave the default "parallel".
    dim_sem = (pltpu.CORE_PARALLEL if core_parallel else "parallel",)

    out = pl.pallas_call(
        autoencoder_kernel,
        out_shape=jax.ShapeDtypeStruct((Bpad, Fout), jnp.float32),
        grid=grid,
        in_specs=[pl.BlockSpec((TB, Fin), lambda i: (i, 0))]
                 + [pl.BlockSpec(c.shape, lambda i: (0, 0)) for c in consts],
        out_specs=pl.BlockSpec((TB, Fout), lambda i: (i, 0)),
        compiler_params=pltpu.CompilerParams(
            dimension_semantics=dim_sem,
            # actual use is only a few MB; 48 MiB is a safe raise on v5e's 16 MiB
            # scoped default and stays under v7x's 64 MiB physical VMEM.
            vmem_limit_bytes=48 * 1024 * 1024),
    )(x, *consts)

    # drop batch padding, drop per-channel length padding, flatten(start_dim=1)
    return out[:B].reshape(B, 3, Pu2)[:, :, :Lup2].reshape(B, 3 * Lup2)


# ----------------------- independent pure-JAX reference --------------------- #
def reference_forward(x_flat, params, winsize=WINSIZE):
    B = x_flat.shape[0]
    x = x_flat.reshape(B, 3, winsize)
    w1, b1, w2, b2, w3, b3, wd1, bd1, wd2, bd2, wd3, bd3 = params

    def conv(x, w, b, pad):
        y = lax.conv_general_dilated(x, w, (1,), [(pad, pad)],
                                     dimension_numbers=("NCH", "OIH", "NCH"))
        return y + b[None, :, None]

    def tconv(x, w, b, pad):
        K = w.shape[2]
        w_eq = jnp.flip(w, 2).transpose(1, 0, 2)
        y = lax.conv_general_dilated(x, w_eq, (1,), [(K - 1 - pad, K - 1 - pad)],
                                     dimension_numbers=("NCH", "OIH", "NCH"))
        return y + b[None, :, None]

    def pool(x):
        Bn, C, L = x.shape
        L3 = L // 3
        return jnp.max(x[:, :, :L3 * 3].reshape(Bn, C, L3, 3), axis=-1)

    def up3(x):
        return jnp.repeat(x, 3, axis=2)

    def up309(x):
        Lin = x.shape[2]
        Lout = (Lin * 309) // 100
        src = np.minimum((np.arange(Lout) * 100) // 309, Lin - 1)
        return x[:, :, src]

    h = conv(x, w1, b1, 7); h = pool(h); h = jax.nn.relu(h)
    h = conv(h, w2, b2, 4); h = jax.nn.relu(h); h = pool(h)
    h = conv(h, w3, b3, 2); h = jax.nn.relu(h)
    h = tconv(h, wd1, bd1, 2); h = jax.nn.relu(h)
    h = up3(h); h = jax.nn.relu(h)
    h = tconv(h, wd2, bd2, 4)
    h = up309(h); h = jax.nn.relu(h)
    h = tconv(h, wd3, bd3, 7)
    return h.reshape(B, -1)


# ------------------------------------ main ----------------------------------- #
if __name__ == "__main__":
    key = jax.random.PRNGKey(0)
    keys = jax.random.split(key, 14)

    def u(k, shape, fan_in):
        bound = 1.0 / np.sqrt(fan_in)
        return jax.random.uniform(k, shape, jnp.float32, -bound, bound)

    # shapes exactly as in the PyTorch module's __init__
    w1 = u(keys[0], (16, 3, 15), 3 * 15);    b1 = u(keys[1], (16,), 3 * 15)
    w2 = u(keys[2], (8, 16, 9), 16 * 9);     b2 = u(keys[3], (8,), 16 * 9)
    w3 = u(keys[4], (4, 8, 5), 8 * 5);       b3 = u(keys[5], (4,), 8 * 5)
    wd1 = u(keys[6], (4, 8, 5), 4 * 5);      bd1 = u(keys[7], (8,), 4 * 5)
    wd2 = u(keys[8], (8, 16, 9), 8 * 9);     bd2 = u(keys[9], (16,), 8 * 9)
    wd3 = u(keys[10], (16, 3, 15), 16 * 15); bd3 = u(keys[11], (3,), 16 * 15)
    params = (w1, b1, w2, b2, w3, b3, wd1, bd1, wd2, bd2, wd3, bd3)

    # small correctness run (grid = 1)
    x = jax.random.normal(keys[12], (2, 3 * WINSIZE), jnp.float32)
    out = jax.block_until_ready(conv_autoencoder_improved(x, params))
    ref = jax.block_until_ready(reference_forward(x, params))
    assert out.shape == (2, 3 * 92), out.shape
    assert bool(jnp.all(jnp.isfinite(out)))
    np.testing.assert_allclose(np.asarray(out), np.asarray(ref), rtol=2e-2, atol=2e-2)

    # multi-step grid run (grid = 3) to exercise the pipelined path
    x2 = jax.random.normal(keys[13], (24, 3 * WINSIZE), jnp.float32)
    out2 = jax.block_until_ready(conv_autoencoder_improved(x2, params, batch_tile=8))
    ref2 = jax.block_until_ready(reference_forward(x2, params))
    np.testing.assert_allclose(np.asarray(out2), np.asarray(ref2), rtol=2e-2, atol=2e-2)

    print("KERNEL_OK")
</pallas_src>

<mosaic_0001>
module attributes {stable_mosaic.version = 11 : i64} {
  func.func @autoencoder_kernel(%arg0: i32, %arg1: memref<8x288xf32, #tpu.memory_space<vmem>>, %arg2: memref<288x1536xbf16, #tpu.memory_space<vmem>>, %arg3: memref<1x512xf32, #tpu.memory_space<vmem>>, %arg4: memref<512x384xbf16, #tpu.memory_space<vmem>>, %arg5: memref<1x128xf32, #tpu.memory_space<vmem>>, %arg6: memref<128x64xbf16, #tpu.memory_space<vmem>>, %arg7: memref<1x64xf32, #tpu.memory_space<vmem>>, %arg8: memref<64x128xbf16, #tpu.memory_space<vmem>>, %arg9: memref<1x128xf32, #tpu.memory_space<vmem>>, %arg10: memref<128x512xbf16, #tpu.memory_space<vmem>>, %arg11: memref<1x512xf32, #tpu.memory_space<vmem>>, %arg12: memref<512x288xbf16, #tpu.memory_space<vmem>>, %arg13: memref<1x288xf32, #tpu.memory_space<vmem>>, %arg14: memref<8x288xf32, #tpu.memory_space<vmem>>) attributes {dimension_semantics = [#tpu.dimension_semantics<parallel>], iteration_bounds = array<i64: 1>, scalar_prefetch = 0 : i64, scratch_operands = 0 : i64, tpu.core_type = #tpu.core_type<tc>, window_params = [{transform_indices = @transform_0, window_bounds = array<i64: 8, 288>}, {pipeline_mode = #tpu.pipeline_mode<synchronous>, transform_indices = @transform_1, window_bounds = array<i64: 288, 1536>}, {pipeline_mode = #tpu.pipeline_mode<synchronous>, transform_indices = @transform_2, window_bounds = array<i64: 1, 512>}, {pipeline_mode = #tpu.pipeline_mode<synchronous>, transform_indices = @transform_3, window_bounds = array<i64: 512, 384>}, {pipeline_mode = #tpu.pipeline_mode<synchronous>, transform_indices = @transform_4, window_bounds = array<i64: 1, 128>}, {pipeline_mode = #tpu.pipeline_mode<synchronous>, transform_indices = @transform_5, window_bounds = array<i64: 128, 64>}, {pipeline_mode = #tpu.pipeline_mode<synchronous>, transform_indices = @transform_6, window_bounds = array<i64: 1, 64>}, {pipeline_mode = #tpu.pipeline_mode<synchronous>, transform_indices = @transform_7, window_bounds = array<i64: 64, 128>}, {pipeline_mode = #tpu.pipeline_mode<synchronous>, transform_indices = @transform_8, window_bounds = array<i64: 1, 128>}, {pipeline_mode = #tpu.pipeline_mode<synchronous>, transform_indices = @transform_9, window_bounds = array<i64: 128, 512>}, {pipeline_mode = #tpu.pipeline_mode<synchronous>, transform_indices = @transform_10, window_bounds = array<i64: 1, 512>}, {pipeline_mode = #tpu.pipeline_mode<synchronous>, transform_indices = @transform_11, window_bounds = array<i64: 512, 288>}, {pipeline_mode = #tpu.pipeline_mode<synchronous>, transform_indices = @transform_12, window_bounds = array<i64: 1, 288>}, {transform_indices = @transform_13, window_bounds = array<i64: 8, 288>}]} {
    %c0 = arith.constant 0 : index
    %c0_0 = arith.constant 0 : index
    %0 = vector.load %arg1[%c0, %c0_0] : memref<8x288xf32, #tpu.memory_space<vmem>>, vector<8x288xf32>
    %1 = arith.truncf %0 : vector<8x288xf32> to vector<8x288xbf16>
    %c0_1 = arith.constant 0 : index
    %c0_2 = arith.constant 0 : index
    %2 = vector.load %arg2[%c0_1, %c0_2] : memref<288x1536xbf16, #tpu.memory_space<vmem>>, vector<288x1536xbf16>
    %cst = arith.constant dense<0.000000e+00> : vector<8x1536xf32>
    %3 = tpu.matmul %1, %2, %cst {dimension_numbers = #tpu.dot_dimension_numbers<[1], [0], [0], [1], [0, 0, 1, 1], [], []>} : vector<8x288xbf16>, vector<288x1536xbf16>, vector<8x1536xf32> -> vector<8x1536xf32>
    %4 = vector.extract_strided_slice %3 {offsets = [0, 0], sizes = [8, 512], strides = [1, 1]} : vector<8x1536xf32> to vector<8x512xf32>
    %5 = vector.extract_strided_slice %3 {offsets = [0, 512], sizes = [8, 512], strides = [1, 1]} : vector<8x1536xf32> to vector<8x512xf32>
    %6 = arith.maximumf %4, %5 : vector<8x512xf32>
    %7 = vector.extract_strided_slice %3 {offsets = [0, 1024], sizes = [8, 512], strides = [1, 1]} : vector<8x1536xf32> to vector<8x512xf32>
    %8 = arith.maximumf %6, %7 : vector<8x512xf32>
    %c0_3 = arith.constant 0 : index
    %c0_4 = arith.constant 0 : index
    %9 = vector.load %arg3[%c0_3, %c0_4] : memref<1x512xf32, #tpu.memory_space<vmem>>, vector<1x512xf32>
    %10 = vector.broadcast %9 : vector<1x512xf32> to vector<8x512xf32>
    %11 = arith.addf %8, %10 : vector<8x512xf32>
    %cst_5 = arith.constant 0.000000e+00 : f32
    %12 = vector.broadcast %cst_5 : f32 to vector<8x512xf32>
    %13 = arith.maximumf %11, %12 : vector<8x512xf32>
    %14 = arith.truncf %13 : vector<8x512xf32> to vector<8x512xbf16>
    %c0_6 = arith.constant 0 : index
    %c0_7 = arith.constant 0 : index
    %15 = vector.load %arg4[%c0_6, %c0_7] : memref<512x384xbf16, #tpu.memory_space<vmem>>, vector<512x384xbf16>
    %cst_8 = arith.constant dense<0.000000e+00> : vector<8x384xf32>
    %16 = tpu.matmul %14, %15, %cst_8 {dimension_numbers = #tpu.dot_dimension_numbers<[1], [0], [0], [1], [0, 0, 1, 1], [], []>} : vector<8x512xbf16>, vector<512x384xbf16>, vector<8x384xf32> -> vector<8x384xf32>
    %17 = vector.extract_strided_slice %16 {offsets = [0, 0], sizes = [8, 128], strides = [1, 1]} : vector<8x384xf32> to vector<8x128xf32>
    %18 = vector.extract_strided_slice %16 {offsets = [0, 128], sizes = [8, 128], strides = [1, 1]} : vector<8x384xf32> to vector<8x128xf32>
    %19 = arith.maximumf %17, %18 : vector<8x128xf32>
    %20 = vector.extract_strided_slice %16 {offsets = [0, 256], sizes = [8, 128], strides = [1, 1]} : vector<8x384xf32> to vector<8x128xf32>
    %21 = arith.maximumf %19, %20 : vector<8x128xf32>
    %c0_9 = arith.constant 0 : index
    %c0_10 = arith.constant 0 : index
    %22 = vector.load %arg5[%c0_9, %c0_10] : memref<1x128xf32, #tpu.memory_space<vmem>>, vector<1x128xf32>
    %23 = vector.broadcast %22 : vector<1x128xf32> to vector<8x128xf32>
    %24 = arith.addf %21, %23 : vector<8x128xf32>
    %cst_11 = arith.constant 0.000000e+00 : f32
    %25 = vector.broadcast %cst_11 : f32 to vector<8x128xf32>
    %26 = arith.maximumf %24, %25 : vector<8x128xf32>
    %27 = arith.truncf %26 : vector<8x128xf32> to vector<8x128xbf16>
    %c0_12 = arith.constant 0 : index
    %c0_13 = arith.constant 0 : index
    %28 = vector.load %arg6[%c0_12, %c0_13] : memref<128x64xbf16, #tpu.memory_space<vmem>>, vector<128x64xbf16>
    %cst_14 = arith.constant dense<0.000000e+00> : vector<8x64xf32>
    %29 = tpu.matmul %27, %28, %cst_14 {dimension_numbers = #tpu.dot_dimension_numbers<[1], [0], [0], [1], [0, 0, 1, 1], [], []>} : vector<8x128xbf16>, vector<128x64xbf16>, vector<8x64xf32> -> vector<8x64xf32>
    %c0_15 = arith.constant 0 : index
    %c0_16 = arith.constant 0 : index
    %30 = vector.load %arg7[%c0_15, %c0_16] : memref<1x64xf32, #tpu.memory_space<vmem>>, vector<1x64xf32>
    %31 = vector.broadcast %30 : vector<1x64xf32> to vector<8x64xf32>
    %32 = arith.addf %29, %31 : vector<8x64xf32>
    %cst_17 = arith.constant 0.000000e+00 : f32
    %33 = vector.broadcast %cst_17 : f32 to vector<8x64xf32>
    %34 = arith.maximumf %32, %33 : vector<8x64xf32>
    %35 = arith.truncf %34 : vector<8x64xf32> to vector<8x64xbf16>
    %c0_18 = arith.constant 0 : index
    %c0_19 = arith.constant 0 : index
    %36 = vector.load %arg8[%c0_18, %c0_19] : memref<64x128xbf16, #tpu.memory_space<vmem>>, vector<64x128xbf16>
    %cst_20 = arith.constant dense<0.000000e+00> : vector<8x128xf32>
    %37 = tpu.matmul %35, %36, %cst_20 {dimension_numbers = #tpu.dot_dimension_numbers<[1], [0], [0], [1], [0, 0, 1, 1], [], []>} : vector<8x64xbf16>, vector<64x128xbf16>, vector<8x128xf32> -> vector<8x128xf32>
    %c0_21 = arith.constant 0 : index
    %c0_22 = arith.constant 0 : index
    %38 = vector.load %arg9[%c0_21, %c0_22] : memref<1x128xf32, #tpu.memory_space<vmem>>, vector<1x128xf32>
    %39 = vector.broadcast %38 : vector<1x128xf32> to vector<8x128xf32>
    %40 = arith.addf %37, %39 : vector<8x128xf32>
    %cst_23 = arith.constant 0.000000e+00 : f32
    %41 = vector.broadcast %cst_23 : f32 to vector<8x128xf32>
    %42 = arith.maximumf %40, %41 : vector<8x128xf32>
    %43 = arith.truncf %42 : vector<8x128xf32> to vector<8x128xbf16>
    %c0_24 = arith.constant 0 : index
    %c0_25 = arith.constant 0 : index
    %44 = vector.load %arg10[%c0_24, %c0_25] : memref<128x512xbf16, #tpu.memory_space<vmem>>, vector<128x512xbf16>
    %cst_26 = arith.constant dense<0.000000e+00> : vector<8x512xf32>
    %45 = tpu.matmul %43, %44, %cst_26 {dimension_numbers = #tpu.dot_dimension_numbers<[1], [0], [0], [1], [0, 0, 1, 1], [], []>} : vector<8x128xbf16>, vector<128x512xbf16>, vector<8x512xf32> -> vector<8x512xf32>
    %c0_27 = arith.constant 0 : index
    %c0_28 = arith.constant 0 : index
    %46 = vector.load %arg11[%c0_27, %c0_28] : memref<1x512xf32, #tpu.memory_space<vmem>>, vector<1x512xf32>
    %47 = vector.broadcast %46 : vector<1x512xf32> to vector<8x512xf32>
    %48 = arith.addf %45, %47 : vector<8x512xf32>
    %cst_29 = arith.constant 0.000000e+00 : f32
    %49 = vector.broadcast %cst_29 : f32 to vector<8x512xf32>
    %50 = arith.maximumf %48, %49 : vector<8x512xf32>
    %51 = arith.truncf %50 : vector<8x512xf32> to vector<8x512xbf16>
    %c0_30 = arith.constant 0 : index
    %c0_31 = arith.constant 0 : index
    %52 = vector.load %arg12[%c0_30, %c0_31] : memref<512x288xbf16, #tpu.memory_space<vmem>>, vector<512x288xbf16>
    %cst_32 = arith.constant dense<0.000000e+00> : vector<8x288xf32>
    %53 = tpu.matmul %51, %52, %cst_32 {dimension_numbers = #tpu.dot_dimension_numbers<[1], [0], [0], [1], [0, 0, 1, 1], [], []>} : vector<8x512xbf16>, vector<512x288xbf16>, vector<8x288xf32> -> vector<8x288xf32>
    %c0_33 = arith.constant 0 : index
    %c0_34 = arith.constant 0 : index
    %54 = vector.load %arg13[%c0_33, %c0_34] : memref<1x288xf32, #tpu.memory_space<vmem>>, vector<1x288xf32>
    %55 = vector.broadcast %54 : vector<1x288xf32> to vector<8x288xf32>
    %56 = arith.addf %53, %55 : vector<8x288xf32>
    %c0_35 = arith.constant 0 : index
    %c0_36 = arith.constant 0 : index
    %57 = vector.load %arg14[%c0_35, %c0_36] : memref<8x288xf32, #tpu.memory_space<vmem>>, vector<8x288xf32>
    tpu.vector_store %arg14[%c0_35, %c0_36], %56 {strides = array<i32>} : memref<8x288xf32, #tpu.memory_space<vmem>>, vector<8x288xf32>,
    return
  }
  func.func @transform_0(%arg0: i32) -> (i32, i32) {
    %c0_i32 = arith.constant 0 : i32
    %c0_i32_0 = arith.constant 0 : i32
    return %arg0, %c0_i32 : i32, i32
  }
  func.func @transform_1(%arg0: i32) -> (i32, i32) {
    %c0_i32 = arith.constant 0 : i32
    %c0_i32_0 = arith.constant 0 : i32
    %c0_i32_1 = arith.constant 0 : i32
    return %c0_i32, %c0_i32_0 : i32, i32
  }
  func.func @transform_2(%arg0: i32) -> (i32, i32) {
    %c0_i32 = arith.constant 0 : i32
    %c0_i32_0 = arith.constant 0 : i32
    %c0_i32_1 = arith.constant 0 : i32
    return %c0_i32, %c0_i32_0 : i32, i32
  }
  func.func @transform_3(%arg0: i32) -> (i32, i32) {
    %c0_i32 = arith.constant 0 : i32
    %c0_i32_0 = arith.constant 0 : i32
    %c0_i32_1 = arith.constant 0 : i32
    return %c0_i32, %c0_i32_0 : i32, i32
  }
  func.func @transform_4(%arg0: i32) -> (i32, i32) {
    %c0_i32 = arith.constant 0 : i32
    %c0_i32_0 = arith.constant 0 : i32
    %c0_i32_1 = arith.constant 0 : i32
    return %c0_i32, %c0_i32_0 : i32, i32
  }
  func.func @transform_5(%arg0: i32) -> (i32, i32) {
    %c0_i32 = arith.constant 0 : i32
    %c0_i32_0 = arith.constant 0 : i32
    %c0_i32_1 = arith.constant 0 : i32
    return %c0_i32, %c0_i32_0 : i32, i32
  }
  func.func @transform_6(%arg0: i32) -> (i32, i32) {
    %c0_i32 = arith.constant 0 : i32
    %c0_i32_0 = arith.constant 0 : i32
    %c0_i32_1 = arith.constant 0 : i32
    return %c0_i32, %c0_i32_0 : i32, i32
  }
  func.func @transform_7(%arg0: i32) -> (i32, i32) {
    %c0_i32 = arith.constant 0 : i32
    %c0_i32_0 = arith.constant 0 : i32
    %c0_i32_1 = arith.constant 0 : i32
    return %c0_i32, %c0_i32_0 : i32, i32
  }
  func.func @transform_8(%arg0: i32) -> (i32, i32) {
    %c0_i32 = arith.constant 0 : i32
    %c0_i32_0 = arith.constant 0 : i32
    %c0_i32_1 = arith.constant 0 : i32
    return %c0_i32, %c0_i32_0 : i32, i32
  }
  func.func @transform_9(%arg0: i32) -> (i32, i32) {
    %c0_i32 = arith.constant 0 : i32
    %c0_i32_0 = arith.constant 0 : i32
    %c0_i32_1 = arith.constant 0 : i32
    return %c0_i32, %c0_i32_0 : i32, i32
  }
  func.func @transform_10(%arg0: i32) -> (i32, i32) {
    %c0_i32 = arith.constant 0 : i32
    %c0_i32_0 = arith.constant 0 : i32
    %c0_i32_1 = arith.constant 0 : i32
    return %c0_i32, %c0_i32_0 : i32, i32
  }
  func.func @transform_11(%arg0: i32) -> (i32, i32) {
    %c0_i32 = arith.constant 0 : i32
    %c0_i32_0 = arith.constant 0 : i32
    %c0_i32_1 = arith.constant 0 : i32
    return %c0_i32, %c0_i32_0 : i32, i32
  }
  func.func @transform_12(%arg0: i32) -> (i32, i32) {
    %c0_i32 = arith.constant 0 : i32
    %c0_i32_0 = arith.constant 0 : i32
    %c0_i32_1 = arith.constant 0 : i32
    return %c0_i32, %c0_i32_0 : i32, i32
  }
  func.func @transform_13(%arg0: i32) -> (i32, i32) {
    %c0_i32 = arith.constant 0 : i32
    %c0_i32_0 = arith.constant 0 : i32
    return %arg0, %c0_i32 : i32, i32
  }
}

</mosaic_0001>

<bundles_post_ra>
// kernel: tpu_custom_call.1
= control target key start
LH: loop header
LB: loop body
LE: loop exit
PB: predicated region body
PF: predicated region fallthrough
CT: control target
= control target key end

     0   :  { %18 = vsyncpa [#allocation3], 0  ;;  %s6272_s0 = inlined_call_operand.vmem [shape: f32[8,288], index: 0, kind: input, shape index: {}]   ;;  %s6273_s1 = inlined_call_operand.hbm [shape: bf16[288,1536], index: 1, kind: input, shape index: {}]   ;;  %s6274_s2 = inlined_call_operand.vmem [shape: f32[1,512], index: 2, kind: input, shape index: {}]   ;;  %s6275_s3 = inlined_call_operand.vmem [shape: bf16[512,384], index: 3, kind: input, shape index: {}]   ;;  %s6276_s4 = inlined_call_operand.vmem [shape: f32[1,128], index: 4, kind: input, shape index: {}]   ;;  %s6277_s5 = inlined_call_operand.vmem [shape: bf16[128,64], index: 5, kind: input, shape index: {}]   ;;  %s6278_s6 = inlined_call_operand.vmem [shape: f32[1,64], index: 6, kind: input, shape index: {}]   ;;  %s6279_s7 = inlined_call_operand.vmem [shape: bf16[64,128], index: 7, kind: input, shape index: {}]   ;;  %s6280_s8 = inlined_call_operand.vmem [shape: f32[1,128], index: 8, kind: input, shape index: {}]   ;;  %s6281_s9 = inlined_call_operand.vmem [shape: bf16[128,512], index: 9, kind: input, shape index: {}]   ;;  %s6282_s10 = inlined_call_operand.vmem [shape: f32[1,512], index: 10, kind: input, shape index: {}]   ;;  %s6283_s11 = inlined_call_operand.vmem [shape: bf16[512,288], index: 11, kind: input, shape index: {}]   ;;  %s6284_s12 = inlined_call_operand.vmem [shape: f32[1,288], index: 12, kind: input, shape index: {}]   ;;  %s6285_s13 = inlined_call_operand.hbm [shape: f32[8,288], index: 13, kind: output, shape index: {}]  }
   0x1   :  { %19 = vsyncpa [#allocation4], 0  ;;  %s5340_s25 = smov [#allocation2]  }
   0x2   :  { %s27_s26 = sshll.u32 %s5340_s25, 4  ;;  %s28_s26 = int_to_ptr.vmem [resolvable:$true] %s27_s26 }
   0x3   :  { %s5304_s27 = scalar_lea.vmem %s28_s26, 27648  ;;  %p5309_p1 = scmp.lt.s32.totalorder %s28_s26, %s28_s26 }
   0x4   :  { %p5305_p0 = scmp.ne.s32.totalorder %s28_s26, %s5304_s27  ;;  %p5310_p2 = scmp.lt.s32.totalorder %s5304_s27, %s5304_s27 }
   0x6   :  { %p5311_p3 = por %p5310_p2, %p5309_p1 }
   0x8   :  { %p5312_p4 = pnand %p5311_p3, %p5305_p0 }
   0xa   :  { %5315 = shalt.err (!%p5312_p4)
}
   0xb   :  { %s5341_s28 = smov 768   ;;  %s5342_s29 = smov 48  }
   0xc   :  { %33 = dma.hbm_to_vmem [thread:$0]  %s6273_s1, 27648, %s28_s26, [#allocation3], %s5341_s28, %s5341_s28, %s5342_s29  }
   0xd   :  { %5336 = dma.done.wait [#allocation3], 27648  }
   0xe   :  { %5337 = vsyncadd [#allocation3], 4294939648  ;;  %v5343_v0 = vmov 0   ;;  %v4656_v1 = vld [vmem:[#allocation2 + $0x2a4] ss:$48 sps:$4 sm:$0xff]   ;;  %vm1362_vm0 = vcmask 261120  }
   0xf   :  { %1439 = vmatprep.mubr.bf16.mxu1 %v5343_v0  ;;  %v4658_v2 = vld [vmem:[#allocation2 + $0x664] ss:$48 sps:$4 sm:$0xff]   ;;  %1366 = vmatprep.subr.bf16.mxu0 %v4656_v1  ;;  %v4660_v3 = vld [vmem:[#allocation2 + $0x2a0] ss:$48 sps:$4 sm:$0xff]   ;;  %v4670_v12 = vld [vmem:[#allocation2 + $0x2a8] ss:$48 sps:$4 sm:$0xff]  }
  0x10   :  { %v4661_v4 = vld [vmem:[#allocation2 + $0x660] ss:$48 sps:$4 sm:$0xff]   ;;  %1419 = vmatprep.subr.bf16.mxu1 %v4658_v2  ;;  %v4662_v5 = vld [vmem:[#allocation2 + $0x244] ss:$48 sps:$4 sm:$0xff]   ;;  %1367 = vmatpush1.bf16.msra.mxu0 %v4660_v3  ;;  %v4672_v13 = vld [vmem:[#allocation2 + $0x2ac] ss:$48 sps:$4 sm:$0xff]  }
  0x11   :  { %1420 = vmatpush1.bf16.msra.mxu1 %v4661_v4  ;;  %v4664_v6 = vld [vmem:[#allocation2 + $0x604] ss:$48 sps:$4 sm:$0xff]   ;;  %v4666_v7 = vld [vmem:[#allocation2 + $0x240] ss:$48 sps:$4 sm:$0xff]   ;;  %1368 = vmatprep.subr.bf16.mxu0 %v4662_v5  ;;  %v4678_v16 = vld [vmem:[#allocation2 + $0x24c] ss:$48 sps:$4 sm:$0xff]  }
  0x12   :  { %v4667_v8 = vld [vmem:[#allocation2 + $0x600] ss:$48 sps:$4 sm:$0xff]   ;;  %1421 = vmatprep.subr.bf16.mxu1 %v4664_v6  ;;  %v4668_v9 = vld [vmem:[#allocation2 + $0x1e4] ss:$48 sps:$4 sm:$0xff]   ;;  %v4676_v17 = vld [vmem:[#allocation2 + $0x248] ss:$48 sps:$4 sm:$0xff]  }
  0x13   :  { %v62_v10 = vld [vmem:[%s6272_s0 + $0x10] sm:$0xff]  ;;  %v4684_v20 = vld [vmem:[#allocation2 + $0x1ec] ss:$48 sps:$4 sm:$0xff]   ;;  %v4682_v21 = vld [vmem:[#allocation2 + $0x1e8] ss:$48 sps:$4 sm:$0xff]   ;;  %vm5345_vm1 = vmmov 0  }
  0x14   :  { %v5424_v11 = vpack.c.bf16 %v62_v10, %v62_v10  ;;  %1369 = vmatpush1.bf16.msra.mxu0 %v4666_v7  ;;  %v4673_v14 = vld [vmem:[#allocation2 + $0x1e0] ss:$48 sps:$4 sm:$0xff]   ;;  %v4674_v15 = vld [vmem:[#allocation2 + $0x184] ss:$48 sps:$4 sm:$0xff]   ;;  %v4690_v24 = vld [vmem:[#allocation2 + $0x18c] ss:$48 sps:$4 sm:$0xff]  }
  0x15   :  { %1422 = vmatpush1.bf16.msra.mxu1 %v4667_v8  ;;  %1370 = vmatprep.subr.bf16.mxu0 %v4668_v9  ;;  %v4679_v18 = vld [vmem:[#allocation2 + $0x180] ss:$48 sps:$4 sm:$0xff]   ;;  %v4680_v19 = vld [vmem:[#allocation2 + $0x124] ss:$48 sps:$4 sm:$0xff]   ;;  %v4688_v25 = vld [vmem:[#allocation2 + $0x188] ss:$48 sps:$4 sm:$0xff]  }
  0x16   :  { %1448 = vmatprep.subr.bf16.mxu1 %v4672_v13  ;;  %v4685_v22 = vld [vmem:[#allocation2 + $0x120] ss:$48 sps:$4 sm:$0xff]   ;;  %v4686_v23 = vld [vmem:[#allocation2 + $0xc4] ss:$48 sps:$4 sm:$0xff]   ;;  %v4696_v28 = vld [vmem:[#allocation2 + $0x12c] ss:$48 sps:$4 sm:$0xff]  }
  0x17   :  { %v4691_v26 = vld [vmem:[#allocation2 + $0xc0] ss:$48 sps:$4 sm:$0xff]   ;;  %v4692_v27 = vld [vmem:[#allocation2 + $0x64] ss:$48 sps:$4 sm:$0xff]   ;;  %v4694_v29 = vld [vmem:[#allocation2 + $0x128] ss:$48 sps:$4 sm:$0xff]  }
  0x18   :  { %4269 = vmatmul.mubr.msk.bf16.vlgmr.msra.gmra.mxu1 %vm1362_vm0, %v5424_v11  ;;  %1371 = vmatpush1.bf16.msra.mxu0 %v4673_v14  ;;  %v4697_v30 = vld [vmem:[#allocation2 + $0x60] ss:$48 sps:$4 sm:$0xff]   ;;  %v4698_v31 = vld [vmem:[#allocation2 + $0x4] ss:$48 sps:$4 sm:$0xff]   ;;  %v4702_v32 = vld [vmem:[#allocation2 + $0xcc] ss:$48 sps:$4 sm:$0xff]  }
  0x19   :  { %1449 = vmatpush1.bf16.msra.mxu1 %v4670_v12  ;;  %1372 = vmatprep.subr.bf16.mxu0 %v4674_v15  ;;  %v4700_v33 = vld [vmem:[#allocation2 + $0xc8] ss:$48 sps:$4 sm:$0xff]   ;;  %v4703_v34 = vld [vmem:[#allocation2] ss:$48 sps:$4 sm:$0xff]   ;;  %v4704_v35 = vld [vmem:[#allocation2 + $0x5a4] ss:$48 sps:$4 sm:$0xff]  }
  0x1a   :  { %1450 = vmatprep.subr.bf16.mxu1 %v4678_v16  ;;  %v4708_v36 = vld [vmem:[#allocation2 + $0x6c] ss:$48 sps:$4 sm:$0xff]   ;;  %v4706_v37 = vld [vmem:[#allocation2 + $0x68] ss:$48 sps:$4 sm:$0xff]   ;;  %v4709_v38 = vld [vmem:[#allocation2 + $0x5a0] ss:$48 sps:$4 sm:$0xff]  }
  0x1b   :  { %v4710_v39 = vld [vmem:[#allocation2 + $0x544] ss:$48 sps:$4 sm:$0xff]   ;;  %v4714_v40 = vld [vmem:[#allocation2 + $0xc] ss:$48 sps:$4 sm:$0xff]   ;;  %v4712_v41 = vld [vmem:[#allocation2 + $0x8] ss:$48 sps:$4 sm:$0xff]  }
  0x1c   :  { %1373 = vmatpush1.bf16.msra.mxu0 %v4679_v18  ;;  %v4715_v42 = vld [vmem:[#allocation2 + $0x540] ss:$48 sps:$4 sm:$0xff]   ;;  %v4716_v43 = vld [vmem:[#allocation2 + $0x4e4] ss:$48 sps:$4 sm:$0xff]   ;;  %v4720_v44 = vld [vmem:[#allocation2 + $0x5ac] ss:$48 sps:$4 sm:$0xff]  }
  0x1d   :  { %1451 = vmatpush1.bf16.msra.mxu1 %v4676_v17  ;;  %1374 = vmatprep.subr.bf16.mxu0 %v4680_v19  ;;  %v4718_v45 = vld [vmem:[#allocation2 + $0x5a8] ss:$48 sps:$4 sm:$0xff]   ;;  %v4721_v46 = vld [vmem:[#allocation2 + $0x4e0] ss:$48 sps:$4 sm:$0xff]   ;;  %v4722_v47 = vld [vmem:[#allocation2 + $0x484] ss:$48 sps:$4 sm:$0xff]  }
  0x1e   :  { %1452 = vmatprep.subr.bf16.mxu1 %v4684_v20  ;;  %v4726_v48 = vld [vmem:[#allocation2 + $0x54c] ss:$48 sps:$4 sm:$0xff]   ;;  %v4724_v49 = vld [vmem:[#allocation2 + $0x548] ss:$48 sps:$4 sm:$0xff]   ;;  %v4727_v51 = vld [vmem:[#allocation2 + $0x480] ss:$48 sps:$4 sm:$0xff]  }
  0x1f   :  { %v61_v50 = vld [vmem:[%s6272_s0 + $0x8] sm:$0xff]  ;;  %v4728_v52 = vld [vmem:[#allocation2 + $0x424] ss:$48 sps:$4 sm:$0xff]   ;;  %v4733_v56 = vld [vmem:[#allocation2 + $0x420] ss:$48 sps:$4 sm:$0xff]   ;;  %vm2866_vm2 = vcmask 523264  }
  0x20   :  { %1375 = vmatpush1.bf16.msra.mxu0 %v4685_v22  ;;  %v5431_v53 = vpack.c.bf16 %v61_v50, %v61_v50  ;;  %v4732_v54 = vld [vmem:[#allocation2 + $0x4ec] ss:$48 sps:$4 sm:$0xff]   ;;  %v4730_v55 = vld [vmem:[#allocation2 + $0x4e8] ss:$48 sps:$4 sm:$0xff]   ;;  %v4734_v57 = vld [vmem:[#allocation2 + $0x3c4] ss:$48 sps:$4 sm:$0xff]  }
  0x21   :  { %1453 = vmatpush1.bf16.msra.mxu1 %v4682_v21  ;;  %1376 = vmatprep.subr.bf16.mxu0 %v4686_v23  ;;  %v4738_v58 = vld [vmem:[#allocation2 + $0x48c] ss:$48 sps:$4 sm:$0xff]   ;;  %v4736_v59 = vld [vmem:[#allocation2 + $0x488] ss:$48 sps:$4 sm:$0xff]   ;;  %v4739_v60 = vld [vmem:[#allocation2 + $0x3c0] ss:$48 sps:$4 sm:$0xff]  }
  0x22   :  { %1454 = vmatprep.subr.bf16.mxu1 %v4690_v24  ;;  %1398 = vmatprep.mubr.bf16.mxu0 %v5431_v53  ;;  %v4740_v61 = vld [vmem:[#allocation2 + $0x364] ss:$48 sps:$4 sm:$0xff]   ;;  %v4744_v62 = vld [vmem:[#allocation2 + $0x42c] ss:$48 sps:$4 sm:$0xff]   ;;  %v4742_v63 = vld [vmem:[#allocation2 + $0x428] ss:$48 sps:$4 sm:$0xff]  }
  0x23   :  { %1480 = vmatprep.mubr.bf16.mxu1 %v5431_v53  ;;  %v4745_v1 = vld [vmem:[#allocation2 + $0x360] ss:$48 sps:$4 sm:$0xff]   ;;  %v4746_v2 = vld [vmem:[#allocation2 + $0x304] ss:$48 sps:$4 sm:$0xff]   ;;  %v4750_v3 = vld [vmem:[#allocation2 + $0x3cc] ss:$48 sps:$4 sm:$0xff]  }
  0x24   :  { %1377 = vmatpush1.bf16.msra.mxu0 %v4691_v26  ;;  %v4748_v4 = vld [vmem:[#allocation2 + $0x3c8] ss:$48 sps:$4 sm:$0xff]   ;;  %v4751_v5 = vld [vmem:[#allocation2 + $0x300] ss:$48 sps:$4 sm:$0xff]   ;;  %v4754_v7 = vld [vmem:[#allocation2 + $0x36c] ss:$48 sps:$4 sm:$0xff]  }
  0x25   :  { %1455 = vmatpush1.bf16.msra.mxu1 %v4688_v25  ;;  %1378 = vmatprep.subr.bf16.mxu0 %v4692_v27  ;;  %v60_v6 = vld [vmem:[%s6272_s0] sm:$0xff]  ;;  %v4752_v10 = vld [vmem:[#allocation2 + $0x368] ss:$48 sps:$4 sm:$0xff]   ;;  %v4760_v13 = vld [vmem:[#allocation2 + $0x30c] ss:$48 sps:$4 sm:$0xff]  }
  0x26   :  { %1456 = vmatprep.subr.bf16.mxu1 %v4696_v28  ;;  %v4757_v8 = vld [vmem:[#allocation2 + $0x2b4] ss:$48 sps:$4 sm:$0xff]   ;;  %v5438_v9 = vpack.c.bf16 %v60_v6, %v60_v6  ;;  %v4755_v12 = vld [vmem:[#allocation2 + $0x2b0] ss:$48 sps:$4 sm:$0xff]   ;;  %v4758_v15 = vld [vmem:[#allocation2 + $0x308] ss:$48 sps:$4 sm:$0xff]  }
  0x27   :  { %v4763_v14 = vld [vmem:[#allocation2 + $0x254] ss:$48 sps:$4 sm:$0xff]   ;;  %v4761_v16 = vld [vmem:[#allocation2 + $0x250] ss:$48 sps:$4 sm:$0xff]   ;;  %v4766_v17 = vld [vmem:[#allocation2 + $0x66c] ss:$48 sps:$4 sm:$0xff]  }
  0x28   :  { %1379 = vmatpush1.bf16.msra.mxu0 %v4697_v30  ;;  %v4769_v18 = vld [vmem:[#allocation2 + $0x1f4] ss:$48 sps:$4 sm:$0xff]   ;;  %v4764_v19 = vld [vmem:[#allocation2 + $0x668] ss:$48 sps:$4 sm:$0xff]   ;;  %v4767_v20 = vld [vmem:[#allocation2 + $0x1f0] ss:$48 sps:$4 sm:$0xff]  }
  0x29   :  { %1457 = vmatpush1.bf16.msra.mxu1 %v4694_v29  ;;  %1380 = vmatprep.subr.bf16.mxu0 %v4698_v31  ;;  %v4772_v21 = vld [vmem:[#allocation2 + $0x60c] ss:$48 sps:$4 sm:$0xff]   ;;  %v4775_v22 = vld [vmem:[#allocation2 + $0x194] ss:$48 sps:$4 sm:$0xff]   ;;  %v4770_v23 = vld [vmem:[#allocation2 + $0x608] ss:$48 sps:$4 sm:$0xff]  }
  0x2a   :  { %1458 = vmatprep.subr.bf16.mxu1 %v4702_v32  ;;  %v4773_v24 = vld [vmem:[#allocation2 + $0x190] ss:$48 sps:$4 sm:$0xff]   ;;  %v4778_v25 = vld [vmem:[#allocation2 + $0x134] ss:$48 sps:$4 sm:$0xff]   ;;  %v4817_v50 = vld [vmem:[#allocation2 + $0x13c] ss:$48 sps:$4 sm:$0xff]  }
  0x2b   :  { %v4781_v26 = vld [vmem:[#allocation2 + $0x674] ss:$48 sps:$4 sm:$0xff]   ;;  %v4776_v27 = vld [vmem:[#allocation2 + $0x130] ss:$48 sps:$4 sm:$0xff]   ;;  %v4839_v6 = vld [vmem:[#allocation2 + $0x5b8] ss:$48 sps:$4 sm:$0xff]  }
  0x2c   :  { %1381 = vmatpush1.bf16.msra.mxu0 %v4703_v34  ;;  %v4779_v28 = vld [vmem:[#allocation2 + $0x670] ss:$48 sps:$4 sm:$0xff]   ;;  %v4784_v29 = vld [vmem:[#allocation2 + $0xd4] ss:$48 sps:$4 sm:$0xff]   ;;  %v4793_v34 = vld [vmem:[#allocation2 + $0x2bc] ss:$48 sps:$4 sm:$0xff]  }
  0x2d   :  { %1459 = vmatpush1.bf16.msra.mxu1 %v4700_v33  ;;  %1382 = vmatprep.subr.bf16.mxu0 %v4704_v35  ;;  %v4787_v30 = vld [vmem:[#allocation2 + $0x614] ss:$48 sps:$4 sm:$0xff]   ;;  %v4782_v31 = vld [vmem:[#allocation2 + $0xd0] ss:$48 sps:$4 sm:$0xff]  }
  0x2e   :  { %1460 = vmatprep.subr.bf16.mxu1 %v4708_v36  ;;  %v4785_v32 = vld [vmem:[#allocation2 + $0x610] ss:$48 sps:$4 sm:$0xff]   ;;  %v4790_v33 = vld [vmem:[#allocation2 + $0x74] ss:$48 sps:$4 sm:$0xff]   ;;  %v4791_v36 = vld [vmem:[#allocation2 + $0x2b8] ss:$48 sps:$4 sm:$0xff]  }
  0x2f   :  { %v4788_v35 = vld [vmem:[#allocation2 + $0x70] ss:$48 sps:$4 sm:$0xff]  }
  0x30   :  { %1383 = vmatpush2.bf16.msra.mxu0 %v4709_v38  ;;  %v4799_v38 = vld [vmem:[#allocation2 + $0x25c] ss:$48 sps:$4 sm:$0xff]  }
  0x31   :  { %1461 = vmatpush1.bf16.msra.mxu1 %v4706_v37  ;;  %1384 = vmatprep.subr.bf16.mxu0 %v4710_v39  ;;  %v4796_v37 = vld [vmem:[#allocation2 + $0x14] ss:$48 sps:$4 sm:$0xff]   ;;  %v4794_v39 = vld [vmem:[#allocation2 + $0x10] ss:$48 sps:$4 sm:$0xff]  }
  0x32   :  { %1462 = vmatprep.subr.bf16.mxu1 %v4714_v40  ;;  %v4797_v40 = vld [vmem:[#allocation2 + $0x258] ss:$48 sps:$4 sm:$0xff]  }
  0x34   :  { %1385 = vmatpush2.bf16.msra.mxu0 %v4715_v42  ;;  %v4805_v42 = vld [vmem:[#allocation2 + $0x1fc] ss:$48 sps:$4 sm:$0xff]  }
  0x35   :  { %1463 = vmatpush1.bf16.msra.mxu1 %v4712_v41  ;;  %1386 = vmatprep.subr.bf16.mxu0 %v4716_v43  ;;  %v4802_v41 = vld [vmem:[#allocation2 + $0x5b4] ss:$48 sps:$4 sm:$0xff]   ;;  %v4800_v43 = vld [vmem:[#allocation2 + $0x5b0] ss:$48 sps:$4 sm:$0xff]  }
  0x36   :  { %1464 = vmatprep.subr.bf16.mxu1 %v4720_v44  ;;  %v4803_v44 = vld [vmem:[#allocation2 + $0x1f8] ss:$48 sps:$4 sm:$0xff]  }
  0x38   :  { %1387 = vmatpush2.bf16.msra.mxu0 %v4721_v46  ;;  %v4811_v46 = vld [vmem:[#allocation2 + $0x19c] ss:$48 sps:$4 sm:$0xff]  }
  0x39   :  { %1465 = vmatpush2.bf16.msra.mxu1 %v4718_v45  ;;  %1388 = vmatprep.subr.bf16.mxu0 %v4722_v47  ;;  %v4808_v45 = vld [vmem:[#allocation2 + $0x554] ss:$48 sps:$4 sm:$0xff]   ;;  %v4806_v47 = vld [vmem:[#allocation2 + $0x550] ss:$48 sps:$4 sm:$0xff]  }
  0x3a   :  { %1466 = vmatprep.subr.bf16.mxu1 %v4726_v48  ;;  %v4809_v48 = vld [vmem:[#allocation2 + $0x198] ss:$48 sps:$4 sm:$0xff]  }
  0x3c   :  { %1389 = vmatpush2.bf16.msra.mxu0 %v4727_v51  ;;  %v4812_v51 = vld [vmem:[#allocation2 + $0x4f0] ss:$48 sps:$4 sm:$0xff]  }
  0x3d   :  { %1467 = vmatpush2.bf16.msra.mxu1 %v4724_v49  ;;  %1390 = vmatprep.subr.bf16.mxu0 %v4728_v52  ;;  %v4814_v49 = vld [vmem:[#allocation2 + $0x4f4] ss:$48 sps:$4 sm:$0xff]   ;;  %v4815_v52 = vld [vmem:[#allocation2 + $0x138] ss:$48 sps:$4 sm:$0xff]  }
  0x3e   :  { %1468 = vmatprep.subr.bf16.mxu1 %v4732_v54  ;;  %v4820_v54 = vld [vmem:[#allocation2 + $0x494] ss:$48 sps:$4 sm:$0xff]  }
  0x40   :  { %1391 = vmatpush2.bf16.msra.mxu0 %v4733_v56  ;;  %v4818_v56 = vld [vmem:[#allocation2 + $0x490] ss:$48 sps:$4 sm:$0xff]  }
  0x41   :  { %1469 = vmatpush2.bf16.msra.mxu1 %v4730_v55  ;;  %1392 = vmatprep.subr.bf16.mxu0 %v4734_v57  ;;  %v4823_v55 = vld [vmem:[#allocation2 + $0xdc] ss:$48 sps:$4 sm:$0xff]   ;;  %v4821_v57 = vld [vmem:[#allocation2 + $0xd8] ss:$48 sps:$4 sm:$0xff]  }
  0x42   :  { %1470 = vmatprep.subr.bf16.mxu1 %v4738_v58  ;;  %v4826_v58 = vld [vmem:[#allocation2 + $0x434] ss:$48 sps:$4 sm:$0xff]  }
  0x44   :  { %1393 = vmatpush2.bf16.msra.mxu0 %v4739_v60  ;;  %v4824_v60 = vld [vmem:[#allocation2 + $0x430] ss:$48 sps:$4 sm:$0xff]  }
  0x45   :  { %1471 = vmatpush2.bf16.msra.mxu1 %v4736_v59  ;;  %1394 = vmatprep.subr.bf16.mxu0 %v4740_v61  ;;  %v4829_v59 = vld [vmem:[#allocation2 + $0x7c] ss:$48 sps:$4 sm:$0xff]   ;;  %v4827_v61 = vld [vmem:[#allocation2 + $0x78] ss:$48 sps:$4 sm:$0xff]  }
  0x46   :  { %1472 = vmatprep.subr.bf16.mxu1 %v4744_v62  ;;  %v4832_v62 = vld [vmem:[#allocation2 + $0x3d4] ss:$48 sps:$4 sm:$0xff]  }
  0x48   :  { %1395 = vmatpush2.bf16.msra.mxu0 %v4745_v1  ;;  %v4830_v1 = vld [vmem:[#allocation2 + $0x3d0] ss:$48 sps:$4 sm:$0xff]  }
  0x49   :  { %1473 = vmatpush2.bf16.msra.mxu1 %v4742_v63  ;;  %1396 = vmatprep.subr.bf16.mxu0 %v4746_v2  ;;  %v4835_v63 = vld [vmem:[#allocation2 + $0x1c] ss:$48 sps:$4 sm:$0xff]   ;;  %v4833_v2 = vld [vmem:[#allocation2 + $0x18] ss:$48 sps:$4 sm:$0xff]  }
  0x4a   :  { %1474 = vmatprep.subr.bf16.mxu1 %v4750_v3  ;;  %v4838_v3 = vld [vmem:[#allocation2 + $0x374] ss:$48 sps:$4 sm:$0xff]  }
  0x4c   :  { %1397 = vmatpush2.bf16.msra.mxu0 %v4751_v5  ;;  %v4836_v5 = vld [vmem:[#allocation2 + $0x370] ss:$48 sps:$4 sm:$0xff]  }
  0x4d   :  { %1475 = vmatpush2.bf16.msra.mxu1 %v4748_v4  ;;  %1530 = vmatprep.subr.bf16.mxu0 %v4757_v8  ;;  %v4841_v4 = vld [vmem:[#allocation2 + $0x5bc] ss:$48 sps:$4 sm:$0xff]  }
  0x4e   :  { %1476 = vmatprep.subr.bf16.mxu1 %v4754_v7  ;;  %v4844_v7 = vld [vmem:[#allocation2 + $0x314] ss:$48 sps:$4 sm:$0xff]   ;;  %v4847_v8 = vld [vmem:[#allocation2 + $0x55c] ss:$48 sps:$4 sm:$0xff]  }
  0x4f   :  { %1399 = vmatmul.mubr.bf16.vlgmr.msra.gmra.mxu0 %v5438_v9 }
  0x50   :  { %1531 = vmatpush1.bf16.msra.mxu0 %v4755_v12  ;;  %1562 = vmatprep.mubr.bf16.mxu0 %v5431_v53  ;;  %v4845_v12 = vld [vmem:[#allocation2 + $0x558] ss:$48 sps:$4 sm:$0xff]  }
  0x51   :  { %1477 = vmatpush2.bf16.msra.mxu1 %v4752_v10  ;;  %1532 = vmatprep.subr.bf16.mxu0 %v4763_v14  ;;  %v4842_v10 = vld [vmem:[#allocation2 + $0x310] ss:$48 sps:$4 sm:$0xff]   ;;  %v4853_v14 = vld [vmem:[#allocation2 + $0x67c] ss:$48 sps:$4 sm:$0xff]  }
  0x52   :  { %1478 = vmatprep.subr.bf16.mxu1 %v4760_v13  ;;  %v4850_v13 = vld [vmem:[#allocation2 + $0x4fc] ss:$48 sps:$4 sm:$0xff]  }
  0x54   :  { %1533 = vmatpush1.bf16.msra.mxu0 %v4761_v16  ;;  %v4851_v16 = vld [vmem:[#allocation2 + $0x678] ss:$48 sps:$4 sm:$0xff]  }
  0x55   :  { %1479 = vmatpush2.bf16.msra.mxu1 %v4758_v15  ;;  %1534 = vmatprep.subr.bf16.mxu0 %v4769_v18  ;;  %v4848_v15 = vld [vmem:[#allocation2 + $0x4f8] ss:$48 sps:$4 sm:$0xff]   ;;  %v4859_v18 = vld [vmem:[#allocation2 + $0x61c] ss:$48 sps:$4 sm:$0xff]  }
  0x56   :  { %1501 = vmatprep.subr.bf16.mxu1 %v4766_v17  ;;  %v4856_v17 = vld [vmem:[#allocation2 + $0x49c] ss:$48 sps:$4 sm:$0xff]  }
  0x58   :  { %1481 = vmatmul.mubr.bf16.vlgmr.msra.gmra.mxu1 %v5438_v9  ;;  %1535 = vmatpush1.bf16.msra.mxu0 %v4767_v20  ;;  %v4857_v20 = vld [vmem:[#allocation2 + $0x618] ss:$48 sps:$4 sm:$0xff]  }
  0x59   :  { %1502 = vmatpush1.bf16.msra.mxu1 %v4764_v19  ;;  %1536 = vmatprep.subr.bf16.mxu0 %v4775_v22  ;;  %v4854_v19 = vld [vmem:[#allocation2 + $0x498] ss:$48 sps:$4 sm:$0xff]   ;;  %v4865_v22 = vld [vmem:[#allocation2 + $0x2c4] ss:$48 sps:$4 sm:$0xff]  }
  0x5a   :  { %1503 = vmatprep.subr.bf16.mxu1 %v4772_v21  ;;  %1521 = vmatprep.mubr.bf16.mxu1 %v5343_v0  ;;  %v4862_v21 = vld [vmem:[#allocation2 + $0x43c] ss:$48 sps:$4 sm:$0xff]  }
  0x5c   :  { %1537 = vmatpush1.bf16.msra.mxu0 %v4773_v24  ;;  %v4863_v24 = vld [vmem:[#allocation2 + $0x2c0] ss:$48 sps:$4 sm:$0xff]  }
  0x5d   :  { %1504 = vmatpush1.bf16.msra.mxu1 %v4770_v23  ;;  %1538 = vmatprep.subr.bf16.mxu0 %v4778_v25  ;;  %v4860_v23 = vld [vmem:[#allocation2 + $0x438] ss:$48 sps:$4 sm:$0xff]   ;;  %v4868_v25 = vld [vmem:[#allocation2 + $0x3dc] ss:$48 sps:$4 sm:$0xff]  }
  0x5e   :  { %1583 = vmatprep.subr.bf16.mxu1 %v4781_v26  ;;  %v4871_v26 = vld [vmem:[#allocation2 + $0x264] ss:$48 sps:$4 sm:$0xff]  }
  0x60   :  { %4270 = vmatmul.mubr.msk.bf16.vlgmr.msra.gmra.mxu1 %vm1362_vm0, %v5424_v11  ;;  %1539 = vmatpush1.bf16.msra.mxu0 %v4776_v27  ;;  %v4866_v27 = vld [vmem:[#allocation2 + $0x3d8] ss:$48 sps:$4 sm:$0xff]  }
  0x61   :  { %1584 = vmatpush1.bf16.msra.mxu1 %v4779_v28  ;;  %1540 = vmatprep.subr.bf16.mxu0 %v4784_v29  ;;  %v4869_v28 = vld [vmem:[#allocation2 + $0x260] ss:$48 sps:$4 sm:$0xff]   ;;  %v4874_v29 = vld [vmem:[#allocation2 + $0x37c] ss:$48 sps:$4 sm:$0xff]  }
  0x62   :  { %1585 = vmatprep.subr.bf16.mxu1 %v4787_v30  ;;  %1603 = vmatprep.mubr.bf16.mxu1 %v5343_v0  ;;  %v4877_v30 = vld [vmem:[#allocation2 + $0x204] ss:$48 sps:$4 sm:$0xff]  }
  0x64   :  { %1541 = vmatpush1.bf16.msra.mxu0 %v4782_v31  ;;  %v4872_v31 = vld [vmem:[#allocation2 + $0x378] ss:$48 sps:$4 sm:$0xff]  }
  0x65   :  { %1586 = vmatpush1.bf16.msra.mxu1 %v4785_v32  ;;  %1542 = vmatprep.subr.bf16.mxu0 %v4790_v33  ;;  %v4875_v32 = vld [vmem:[#allocation2 + $0x200] ss:$48 sps:$4 sm:$0xff]   ;;  %v4880_v33 = vld [vmem:[#allocation2 + $0x31c] ss:$48 sps:$4 sm:$0xff]  }
  0x66   :  { %1612 = vmatprep.subr.bf16.mxu1 %v4793_v34  ;;  %v4883_v34 = vld [vmem:[#allocation2 + $0x1a4] ss:$48 sps:$4 sm:$0xff]  }
  0x68   :  { %4271 = vmatmul.mubr.msk.bf16.vlgmr.msra.gmra.mxu1 %vm1362_vm0, %v5424_v11  ;;  %1543 = vmatpush1.bf16.msra.mxu0 %v4788_v35  ;;  %v4878_v35 = vld [vmem:[#allocation2 + $0x318] ss:$48 sps:$4 sm:$0xff]  }
  0x69   :  { %1613 = vmatpush1.bf16.msra.mxu1 %v4791_v36  ;;  %1544 = vmatprep.subr.bf16.mxu0 %v4796_v37  ;;  %v4881_v36 = vld [vmem:[#allocation2 + $0x1a0] ss:$48 sps:$4 sm:$0xff]   ;;  %v4886_v37 = vld [vmem:[#allocation2 + $0x144] ss:$48 sps:$4 sm:$0xff]  }
  0x6a   :  { %1614 = vmatprep.subr.bf16.mxu1 %v4799_v38  ;;  %1644 = vmatprep.mubr.bf16.mxu1 %v5431_v53  ;;  %v4889_v38 = vld [vmem:[#allocation2 + $0x684] ss:$48 sps:$4 sm:$0xff]  }
  0x6c   :  { %1545 = vmatpush1.bf16.msra.mxu0 %v4794_v39  ;;  %v4884_v39 = vld [vmem:[#allocation2 + $0x140] ss:$48 sps:$4 sm:$0xff]  }
  0x6d   :  { %1615 = vmatpush1.bf16.msra.mxu1 %v4797_v40  ;;  %1546 = vmatprep.subr.bf16.mxu0 %v4802_v41  ;;  %v4887_v40 = vld [vmem:[#allocation2 + $0x680] ss:$48 sps:$4 sm:$0xff]   ;;  %v4892_v41 = vld [vmem:[#allocation2 + $0xe4] ss:$48 sps:$4 sm:$0xff]  }
  0x6e   :  { %1616 = vmatprep.subr.bf16.mxu1 %v4805_v42  ;;  %v4895_v42 = vld [vmem:[#allocation2 + $0x624] ss:$48 sps:$4 sm:$0xff]  }
  0x70   :  { %1547 = vmatpush2.bf16.msra.mxu0 %v4800_v43  ;;  %v4890_v43 = vld [vmem:[#allocation2 + $0xe0] ss:$48 sps:$4 sm:$0xff]  }
  0x71   :  { %1617 = vmatpush1.bf16.msra.mxu1 %v4803_v44  ;;  %1548 = vmatprep.subr.bf16.mxu0 %v4808_v45  ;;  %v4893_v44 = vld [vmem:[#allocation2 + $0x620] ss:$48 sps:$4 sm:$0xff]   ;;  %v4898_v45 = vld [vmem:[#allocation2 + $0x84] ss:$48 sps:$4 sm:$0xff]  }
  0x72   :  { %1618 = vmatprep.subr.bf16.mxu1 %v4811_v46  ;;  %v4901_v46 = vld [vmem:[#allocation2 + $0x2cc] ss:$48 sps:$4 sm:$0xff]  }
  0x74   :  { %1549 = vmatpush2.bf16.msra.mxu0 %v4806_v47  ;;  %v4896_v47 = vld [vmem:[#allocation2 + $0x80] ss:$48 sps:$4 sm:$0xff]  }
  0x75   :  { %1619 = vmatpush1.bf16.msra.mxu1 %v4809_v48  ;;  %1550 = vmatprep.subr.bf16.mxu0 %v4814_v49  ;;  %v4899_v48 = vld [vmem:[#allocation2 + $0x2c8] ss:$48 sps:$4 sm:$0xff]   ;;  %v4904_v49 = vld [vmem:[#allocation2 + $0x24] ss:$48 sps:$4 sm:$0xff]  }
  0x76   :  { %1620 = vmatprep.subr.bf16.mxu1 %v4817_v50  ;;  %v4907_v50 = vld [vmem:[#allocation2 + $0x26c] ss:$48 sps:$4 sm:$0xff]  }
  0x78   :  { %1551 = vmatpush2.bf16.msra.mxu0 %v4812_v51  ;;  %v4902_v51 = vld [vmem:[#allocation2 + $0x20] ss:$48 sps:$4 sm:$0xff]  }
  0x79   :  { %1621 = vmatpush1.bf16.msra.mxu1 %v4815_v52  ;;  %1552 = vmatprep.subr.bf16.mxu0 %v4820_v54  ;;  %v4905_v52 = vld [vmem:[#allocation2 + $0x268] ss:$48 sps:$4 sm:$0xff]   ;;  %v4910_v54 = vld [vmem:[#allocation2 + $0x5c4] ss:$48 sps:$4 sm:$0xff]  }
  0x7a   :  { %1622 = vmatprep.subr.bf16.mxu1 %v4823_v55  ;;  %v4913_v55 = vld [vmem:[#allocation2 + $0x20c] ss:$48 sps:$4 sm:$0xff]  }
  0x7c   :  { %1553 = vmatpush2.bf16.msra.mxu0 %v4818_v56  ;;  %v4908_v56 = vld [vmem:[#allocation2 + $0x5c0] ss:$48 sps:$4 sm:$0xff]  }
  0x7d   :  { %1623 = vmatpush1.bf16.msra.mxu1 %v4821_v57  ;;  %1554 = vmatprep.subr.bf16.mxu0 %v4826_v58  ;;  %v4911_v57 = vld [vmem:[#allocation2 + $0x208] ss:$48 sps:$4 sm:$0xff]   ;;  %v4916_v58 = vld [vmem:[#allocation2 + $0x564] ss:$48 sps:$4 sm:$0xff]  }
  0x7e   :  { %1624 = vmatprep.subr.bf16.mxu1 %v4829_v59  ;;  %v4919_v59 = vld [vmem:[#allocation2 + $0x1ac] ss:$48 sps:$4 sm:$0xff]  }
  0x80   :  { %1555 = vmatpush2.bf16.msra.mxu0 %v4824_v60  ;;  %v4914_v60 = vld [vmem:[#allocation2 + $0x560] ss:$48 sps:$4 sm:$0xff]  }
  0x81   :  { %1625 = vmatpush1.bf16.msra.mxu1 %v4827_v61  ;;  %1556 = vmatprep.subr.bf16.mxu0 %v4832_v62  ;;  %v4917_v61 = vld [vmem:[#allocation2 + $0x1a8] ss:$48 sps:$4 sm:$0xff]   ;;  %v4922_v62 = vld [vmem:[#allocation2 + $0x504] ss:$48 sps:$4 sm:$0xff]  }
  0x82   :  { %1626 = vmatprep.subr.bf16.mxu1 %v4835_v63  ;;  %v4925_v63 = vld [vmem:[#allocation2 + $0x14c] ss:$48 sps:$4 sm:$0xff]  }
  0x84   :  { %1557 = vmatpush2.bf16.msra.mxu0 %v4830_v1  ;;  %v4920_v1 = vld [vmem:[#allocation2 + $0x500] ss:$48 sps:$4 sm:$0xff]  }
  0x85   :  { %1627 = vmatpush1.bf16.msra.mxu1 %v4833_v2  ;;  %1558 = vmatprep.subr.bf16.mxu0 %v4838_v3  ;;  %v4923_v2 = vld [vmem:[#allocation2 + $0x148] ss:$48 sps:$4 sm:$0xff]   ;;  %v4928_v3 = vld [vmem:[#allocation2 + $0x4a4] ss:$48 sps:$4 sm:$0xff]  }
  0x86   :  { %1628 = vmatprep.subr.bf16.mxu1 %v4841_v4  ;;  %v4931_v4 = vld [vmem:[#allocation2 + $0xec] ss:$48 sps:$4 sm:$0xff]  }
  0x88   :  { %1559 = vmatpush2.bf16.msra.mxu0 %v4836_v5  ;;  %v4929_v5 = vld [vmem:[#allocation2 + $0xe8] ss:$48 sps:$4 sm:$0xff]  }
  0x89   :  { %1629 = vmatpush2.bf16.msra.mxu1 %v4839_v6  ;;  %1560 = vmatprep.subr.bf16.mxu0 %v4844_v7  ;;  %v4934_v6 = vld [vmem:[#allocation2 + $0x444] ss:$48 sps:$4 sm:$0xff]   ;;  %v4937_v7 = vld [vmem:[#allocation2 + $0x8c] ss:$48 sps:$4 sm:$0xff]  }
  0x8a   :  { %1630 = vmatprep.subr.bf16.mxu1 %v4847_v8  ;;  %v4932_v8 = vld [vmem:[#allocation2 + $0x440] ss:$48 sps:$4 sm:$0xff]  }
  0x8c   :  { %1561 = vmatpush2.bf16.msra.mxu0 %v4842_v10  ;;  %v4935_v10 = vld [vmem:[#allocation2 + $0x88] ss:$48 sps:$4 sm:$0xff]  }
  0x8d   :  { %1631 = vmatpush2.bf16.msra.mxu1 %v4845_v12  ;;  %1665 = vmatprep.subr.bf16.mxu0 %v4853_v14  ;;  %v4940_v12 = vld [vmem:[#allocation2 + $0x3e4] ss:$48 sps:$4 sm:$0xff]   ;;  %v4938_v14 = vld [vmem:[#allocation2 + $0x3e0] ss:$48 sps:$4 sm:$0xff]  }
  0x8e   :  { %1632 = vmatprep.subr.bf16.mxu1 %v4850_v13  ;;  %v4943_v13 = vld [vmem:[#allocation2 + $0x2c] ss:$48 sps:$4 sm:$0xff]  }
  0x8f   :  { %1563 = vmatmul.mubr.bf16.vlgmr.msra.gmra.mxu0 %v5438_v9 }
  0x90   :  { %1666 = vmatpush1.bf16.msra.mxu0 %v4851_v16  ;;  %1685 = vmatprep.mubr.bf16.mxu0 %v5343_v0  ;;  %v4946_v16 = vld [vmem:[#allocation2 + $0x384] ss:$48 sps:$4 sm:$0xff]  }
  0x91   :  { %1633 = vmatpush2.bf16.msra.mxu1 %v4848_v15  ;;  %1667 = vmatprep.subr.bf16.mxu0 %v4859_v18  ;;  %v4941_v15 = vld [vmem:[#allocation2 + $0x28] ss:$48 sps:$4 sm:$0xff]   ;;  %v4944_v18 = vld [vmem:[#allocation2 + $0x380] ss:$48 sps:$4 sm:$0xff]  }
  0x92   :  { %1634 = vmatprep.subr.bf16.mxu1 %v4856_v17  ;;  %v4949_v17 = vld [vmem:[#allocation2 + $0x5cc] ss:$48 sps:$4 sm:$0xff]  }
  0x94   :  { %1668 = vmatpush1.bf16.msra.mxu0 %v4857_v20  ;;  %v4952_v20 = vld [vmem:[#allocation2 + $0x324] ss:$48 sps:$4 sm:$0xff]  }
  0x95   :  { %1635 = vmatpush2.bf16.msra.mxu1 %v4854_v19  ;;  %1694 = vmatprep.subr.bf16.mxu0 %v4865_v22  ;;  %v4947_v19 = vld [vmem:[#allocation2 + $0x5c8] ss:$48 sps:$4 sm:$0xff]   ;;  %v4950_v22 = vld [vmem:[#allocation2 + $0x320] ss:$48 sps:$4 sm:$0xff]  }
  0x96   :  { %1636 = vmatprep.subr.bf16.mxu1 %v4862_v21  ;;  %v4955_v21 = vld [vmem:[#allocation2 + $0x56c] ss:$48 sps:$4 sm:$0xff]  }
  0x97   :  { %4272 = vmatmul.mubr.msk.bf16.vlgmr.msra.gmra.mxu0 %vm1362_vm0, %v5424_v11 }
  0x98   :  { %1695 = vmatpush1.bf16.msra.mxu0 %v4863_v24  ;;  %1726 = vmatprep.mubr.bf16.mxu0 %v5431_v53  ;;  %v4958_v24 = vld [vmem:[#allocation2 + $0x50c] ss:$48 sps:$4 sm:$0xff]  }
  0x99   :  { %1637 = vmatpush2.bf16.msra.mxu1 %v4860_v23  ;;  %1696 = vmatprep.subr.bf16.mxu0 %v4871_v26  ;;  %v4953_v23 = vld [vmem:[#allocation2 + $0x568] ss:$48 sps:$4 sm:$0xff]  }
  0x9a   :  { %1638 = vmatprep.subr.bf16.mxu1 %v4868_v25  ;;  %v4967_v25 = vld [vmem:[#allocation2 + $0x68c] ss:$48 sps:$4 sm:$0xff]   ;;  %v4956_v26 = vld [vmem:[#allocation2 + $0x508] ss:$48 sps:$4 sm:$0xff]  }
  0x9c   :  { %1697 = vmatpush1.bf16.msra.mxu0 %v4869_v28  ;;  %v4961_v28 = vld [vmem:[#allocation2 + $0x4ac] ss:$48 sps:$4 sm:$0xff]  }
  0x9d   :  { %1639 = vmatpush2.bf16.msra.mxu1 %v4866_v27  ;;  %1698 = vmatprep.subr.bf16.mxu0 %v4877_v30  ;;  %v4965_v27 = vld [vmem:[#allocation2 + $0x688] ss:$48 sps:$4 sm:$0xff]  }
  0x9e   :  { %1640 = vmatprep.subr.bf16.mxu1 %v4874_v29  ;;  %v4973_v29 = vld [vmem:[#allocation2 + $0x62c] ss:$48 sps:$4 sm:$0xff]   ;;  %v4959_v30 = vld [vmem:[#allocation2 + $0x4a8] ss:$48 sps:$4 sm:$0xff]  }
  0xa0   :  { %1699 = vmatpush1.bf16.msra.mxu0 %v4875_v32 }
  0xa1   :  { %1641 = vmatpush2.bf16.msra.mxu1 %v4872_v31  ;;  %1700 = vmatprep.subr.bf16.mxu0 %v4883_v34  ;;  %v4971_v31 = vld [vmem:[#allocation2 + $0x628] ss:$48 sps:$4 sm:$0xff]   ;;  %v4964_v34 = vld [vmem:[#allocation2 + $0x44c] ss:$48 sps:$4 sm:$0xff]  }
  0xa2   :  { %1642 = vmatprep.subr.bf16.mxu1 %v4880_v33 }
  0xa4   :  { %1701 = vmatpush1.bf16.msra.mxu0 %v4881_v36  ;;  %v4962_v36 = vld [vmem:[#allocation2 + $0x448] ss:$48 sps:$4 sm:$0xff]  }
  0xa5   :  { %1643 = vmatpush2.bf16.msra.mxu1 %v4878_v35  ;;  %1702 = vmatprep.subr.bf16.mxu0 %v4886_v37  ;;  %v4982_v35 = vld [vmem:[%s6275_s3 + $0xac] ss:$12 sps:$4 sm:$0xff]   ;;  %v4980_v37 = vld [vmem:[%s6275_s3 + $0xa8] ss:$12 sps:$4 sm:$0xff]  }
  0xa6   :  { %1747 = vmatprep.subr.bf16.mxu1 %v4889_v38 }
  0xa8   :  { %1645 = vmatmul.mubr.bf16.vlgmr.msra.gmra.mxu1 %v5438_v9  ;;  %1703 = vmatpush1.bf16.msra.mxu0 %v4884_v39  ;;  %v4970_v39 = vld [vmem:[#allocation2 + $0x3ec] ss:$48 sps:$4 sm:$0xff]  }
  0xa9   :  { %1748 = vmatpush1.bf16.msra.mxu1 %v4887_v40  ;;  %1704 = vmatprep.subr.bf16.mxu0 %v4892_v41  ;;  %v4968_v41 = vld [vmem:[#allocation2 + $0x3e8] ss:$48 sps:$4 sm:$0xff]  }
  0xaa   :  { %1749 = vmatprep.subr.bf16.mxu1 %v4895_v42  ;;  %1767 = vmatprep.mubr.bf16.mxu1 %v5343_v0  ;;  %v4976_v42 = vld [vmem:[#allocation2 + $0x38c] ss:$48 sps:$4 sm:$0xff]  }
  0xac   :  { %1705 = vmatpush1.bf16.msra.mxu0 %v4890_v43  ;;  %v4974_v43 = vld [vmem:[#allocation2 + $0x388] ss:$48 sps:$4 sm:$0xff]  }
  0xad   :  { %1750 = vmatpush1.bf16.msra.mxu1 %v4893_v44  ;;  %1706 = vmatprep.subr.bf16.mxu0 %v4898_v45  ;;  %v4979_v44 = vld [vmem:[#allocation2 + $0x32c] ss:$48 sps:$4 sm:$0xff]   ;;  %v4977_v45 = vld [vmem:[#allocation2 + $0x328] ss:$48 sps:$4 sm:$0xff]  }
  0xae   :  { %1776 = vmatprep.subr.bf16.mxu1 %v4901_v46  ;;  %v4985_v46 = vld [vmem:[%s6275_s3 + $0x94] ss:$12 sps:$4 sm:$0xff]  }
  0xb0   :  { %4273 = vmatmul.mubr.msk.bf16.vlgmr.msra.gmra.mxu1 %vm1362_vm0, %v5424_v11  ;;  %1707 = vmatpush1.bf16.msra.mxu0 %v4896_v47  ;;  %v4983_v47 = vld [vmem:[%s6275_s3 + $0x90] ss:$12 sps:$4 sm:$0xff]  }
  0xb1   :  { %1777 = vmatpush1.bf16.msra.mxu1 %v4899_v48  ;;  %1708 = vmatprep.subr.bf16.mxu0 %v4904_v49  ;;  %v4986_v48 = vld [vmem:[%s6275_s3 + $0x78] ss:$12 sps:$4 sm:$0xff]  }
  0xb2   :  { %1778 = vmatprep.subr.bf16.mxu1 %v4907_v50  ;;  %1808 = vmatprep.mubr.bf16.mxu1 %v5431_v53  ;;  %v4926_v53 = vld [vmem:[#allocation2 + $0x4a0] ss:$48 sps:$4 sm:$0xff]  }
  0xb3   :  { %v4991_v49 = vld [vmem:[%s6275_s3 + $0x64] ss:$12 sps:$4 sm:$0xff]   ;;  %v4989_v50 = vld [vmem:[%s6275_s3 + $0x60] ss:$12 sps:$4 sm:$0xff]  }
  0xb4   :  { %1709 = vmatpush1.bf16.msra.mxu0 %v4902_v51  ;;  %v4994_v51 = vld [vmem:[%s6275_s3 + $0x4c] ss:$12 sps:$4 sm:$0xff]  }
  0xb5   :  { %1779 = vmatpush1.bf16.msra.mxu1 %v4905_v52  ;;  %1710 = vmatprep.subr.bf16.mxu0 %v4910_v54  ;;  %v4992_v52 = vld [vmem:[%s6275_s3 + $0x48] ss:$12 sps:$4 sm:$0xff]  }
  0xb6   :  { %1780 = vmatprep.subr.bf16.mxu1 %v4913_v55  ;;  %v4997_v54 = vld [vmem:[%s6275_s3 + $0x34] ss:$12 sps:$4 sm:$0xff]   ;;  %v5000_v55 = vld [vmem:[%s6275_s3 + $0x1c] ss:$12 sps:$4 sm:$0xff]  }
  0xb8   :  { %1711 = vmatpush2.bf16.msra.mxu0 %v4908_v56  ;;  %v5001_v56 = vld [vmem:[%s6275_s3 + $0x228] ss:$12 sps:$4 sm:$0xff]  }
  0xb9   :  { %1781 = vmatpush1.bf16.msra.mxu1 %v4911_v57  ;;  %1712 = vmatprep.subr.bf16.mxu0 %v4916_v58  ;;  %v5003_v57 = vld [vmem:[%s6275_s3 + $0x22c] ss:$12 sps:$4 sm:$0xff]   ;;  %v5009_v58 = vld [vmem:[%s6275_s3 + $0x214] ss:$12 sps:$4 sm:$0xff]  }
  0xba   :  { %1782 = vmatprep.subr.bf16.mxu1 %v4919_v59  ;;  %v4998_v59 = vld [vmem:[%s6275_s3 + $0x18] ss:$12 sps:$4 sm:$0xff]  }
  0xbc   :  { %1713 = vmatpush2.bf16.msra.mxu0 %v4914_v60  ;;  %v5007_v60 = vld [vmem:[%s6275_s3 + $0x210] ss:$12 sps:$4 sm:$0xff]  }
  0xbd   :  { %1783 = vmatpush1.bf16.msra.mxu1 %v4917_v61  ;;  %1714 = vmatprep.subr.bf16.mxu0 %v4922_v62  ;;  %v5006_v61 = vld [vmem:[%s6275_s3 + $0x4] ss:$12 sps:$4 sm:$0xff]   ;;  %v5015_v62 = vld [vmem:[%s6275_s3 + $0x1fc] ss:$12 sps:$4 sm:$0xff]  }
  0xbe   :  { %1784 = vmatprep.subr.bf16.mxu1 %v4925_v63  ;;  %v5004_v63 = vld [vmem:[%s6275_s3] ss:$12 sps:$4 sm:$0xff]  }
  0xc0   :  { %1715 = vmatpush2.bf16.msra.mxu0 %v4920_v1  ;;  %v5013_v1 = vld [vmem:[%s6275_s3 + $0x1f8] ss:$12 sps:$4 sm:$0xff]  }
  0xc1   :  { %1785 = vmatpush1.bf16.msra.mxu1 %v4923_v2  ;;  %1716 = vmatprep.subr.bf16.mxu0 %v4928_v3  ;;  %v5012_v2 = vld [vmem:[%s6275_s3 + $0x16c] ss:$12 sps:$4 sm:$0xff]   ;;  %v5021_v3 = vld [vmem:[%s6275_s3 + $0x1e4] ss:$12 sps:$4 sm:$0xff]  }
  0xc2   :  { %1786 = vmatprep.subr.bf16.mxu1 %v4931_v4  ;;  %v5010_v4 = vld [vmem:[%s6275_s3 + $0x168] ss:$12 sps:$4 sm:$0xff]  }
  0xc4   :  { %1717 = vmatpush2.bf16.msra.mxu0 %v4926_v53  ;;  %v5019_v53 = vld [vmem:[%s6275_s3 + $0x1e0] ss:$12 sps:$4 sm:$0xff]  }
  0xc5   :  { %1787 = vmatpush1.bf16.msra.mxu1 %v4929_v5  ;;  %1718 = vmatprep.subr.bf16.mxu0 %v4934_v6  ;;  %v5018_v5 = vld [vmem:[%s6275_s3 + $0x154] ss:$12 sps:$4 sm:$0xff]   ;;  %v5027_v6 = vld [vmem:[%s6275_s3 + $0x1cc] ss:$12 sps:$4 sm:$0xff]  }
  0xc6   :  { %1788 = vmatprep.subr.bf16.mxu1 %v4937_v7  ;;  %v5016_v7 = vld [vmem:[%s6275_s3 + $0x150] ss:$12 sps:$4 sm:$0xff]  }
  0xc8   :  { %1719 = vmatpush2.bf16.msra.mxu0 %v4932_v8  ;;  %v5025_v8 = vld [vmem:[%s6275_s3 + $0x1c8] ss:$12 sps:$4 sm:$0xff]  }
  0xc9   :  { %1789 = vmatpush1.bf16.msra.mxu1 %v4935_v10  ;;  %1720 = vmatprep.subr.bf16.mxu0 %v4940_v12  ;;  %v5024_v10 = vld [vmem:[%s6275_s3 + $0x13c] ss:$12 sps:$4 sm:$0xff]   ;;  %v5033_v12 = vld [vmem:[%s6275_s3 + $0x1b4] ss:$12 sps:$4 sm:$0xff]  }
  0xca   :  { %1790 = vmatprep.subr.bf16.mxu1 %v4943_v13  ;;  %v5022_v13 = vld [vmem:[%s6275_s3 + $0x138] ss:$12 sps:$4 sm:$0xff]  }
  0xcc   :  { %1721 = vmatpush2.bf16.msra.mxu0 %v4938_v14  ;;  %v5031_v14 = vld [vmem:[%s6275_s3 + $0x1b0] ss:$12 sps:$4 sm:$0xff]  }
  0xcd   :  { %1791 = vmatpush1.bf16.msra.mxu1 %v4941_v15  ;;  %1722 = vmatprep.subr.bf16.mxu0 %v4946_v16  ;;  %v5030_v15 = vld [vmem:[%s6275_s3 + $0x124] ss:$12 sps:$4 sm:$0xff]   ;;  %v5039_v16 = vld [vmem:[%s6275_s3 + $0x19c] ss:$12 sps:$4 sm:$0xff]  }
  0xce   :  { %1792 = vmatprep.subr.bf16.mxu1 %v4949_v17  ;;  %v5028_v17 = vld [vmem:[%s6275_s3 + $0x120] ss:$12 sps:$4 sm:$0xff]  }
  0xd0   :  { %1723 = vmatpush2.bf16.msra.mxu0 %v4944_v18  ;;  %v5037_v18 = vld [vmem:[%s6275_s3 + $0x198] ss:$12 sps:$4 sm:$0xff]  }
  0xd1   :  { %1793 = vmatpush2.bf16.msra.mxu1 %v4947_v19  ;;  %1724 = vmatprep.subr.bf16.mxu0 %v4952_v20  ;;  %v5036_v19 = vld [vmem:[%s6275_s3 + $0x10c] ss:$12 sps:$4 sm:$0xff]  }
  0xd2   :  { %1794 = vmatprep.subr.bf16.mxu1 %v4955_v21  ;;  %v5034_v21 = vld [vmem:[%s6275_s3 + $0x108] ss:$12 sps:$4 sm:$0xff]  }
  0xd4   :  { %1725 = vmatpush2.bf16.msra.mxu0 %v4950_v22 }
  0xd5   :  { %1795 = vmatpush2.bf16.msra.mxu1 %v4953_v23  ;;  %1829 = vmatprep.subr.bf16.mxu0 %v4967_v25 }
  0xd6   :  { %1796 = vmatprep.subr.bf16.mxu1 %v4958_v24 }
  0xd7   :  { %1727 = vmatmul.mubr.bf16.vlgmr.msra.gmra.mxu0 %v5438_v9 }
  0xd8   :  { %v5460_v32 = vpop.f32.mrf.mxu1  ;;  %1830 = vmatpush1.bf16.msra.mxu0 %v4965_v27  ;;  %1849 = vmatprep.mubr.bf16.mxu0 %v5343_v0  ;;  %v5042_v27 = vld [vmem:[%s6275_s3 + $0xf4] ss:$12 sps:$4 sm:$0xff]  }
  0xd9   :  { %1797 = vmatpush2.bf16.msra.mxu1 %v4956_v26  ;;  %1831 = vmatprep.subr.bf16.mxu0 %v4973_v29 }
  0xda   :  { %v5463_v33 = vpop.f32.mrf.mxu1  ;;  %1798 = vmatprep.subr.bf16.mxu1 %v4961_v28  ;;  %v5045_v28 = vld [vmem:[%s6275_s3 + $0x184] ss:$12 sps:$4 sm:$0xff]  }
  0xdc   :  { %v1445_v38 = vpop.f32.mrf.mxu1  ;;  %1832 = vmatpush1.bf16.msra.mxu0 %v4971_v31  ;;  %v5043_v31 = vld [vmem:[%s6275_s3 + $0x180] ss:$12 sps:$4 sm:$0xff]  }
  0xdd   :  { %1799 = vmatpush2.bf16.msra.mxu1 %v4959_v30  ;;  %2540 = vmatprep.subr.bf16.mxu0 %v4982_v35  ;;  %v5040_v30 = vld [vmem:[%s6275_s3 + $0xf0] ss:$12 sps:$4 sm:$0xff]  }
  0xde   :  { %v1446_v40 = vpop.f32.mrf.mxu1  ;;  %1800 = vmatprep.subr.bf16.mxu1 %v4964_v34  ;;  %v5051_v34 = vld [vmem:[%s6275_s3 + $0x2ec] ss:$12 sps:$4 sm:$0xff]  }
  0xdf   :  { %4274 = vmatmul.mubr.msk.bf16.vlgmr.msra.gmra.mxu0 %vm1362_vm0, %v5424_v11  ;;  %v4988_v11 = vld [vmem:[%s6275_s3 + $0x7c] ss:$12 sps:$4 sm:$0xff]   ;;  %v5057_v40 = vld [vmem:[%s6275_s3 + $0x2d4] ss:$12 sps:$4 sm:$0xff]  }
  0xe0   :  { %2541 = vmatpush1.bf16.msra.mxu0 %v4980_v37  ;;  %v5049_v37 = vld [vmem:[%s6275_s3 + $0x2e8] ss:$12 sps:$4 sm:$0xff]  }
  0xe1   :  { %1801 = vmatpush2.bf16.msra.mxu1 %v4962_v36  ;;  %2542 = vmatprep.subr.bf16.mxu0 %v4985_v46  ;;  %v5046_v36 = vld [vmem:[%s6275_s3 + $0xd8] ss:$12 sps:$4 sm:$0xff]  }
  0xe2   :  { %1802 = vmatprep.subr.bf16.mxu1 %v4970_v39  ;;  %v5054_v39 = vld [vmem:[%s6275_s3 + $0xc4] ss:$12 sps:$4 sm:$0xff]  }
  0xe4   :  { %2543 = vmatpush1.bf16.msra.mxu0 %v4983_v47  ;;  %v5060_v47 = vld [vmem:[%s6275_s3 + $0x2bc] ss:$12 sps:$4 sm:$0xff]  }
  0xe5   :  { %1803 = vmatpush2.bf16.msra.mxu1 %v4968_v41  ;;  %2544 = vmatprep.subr.bf16.mxu0 %v4988_v11  ;;  %v5061_v11 = vld [vmem:[%s6275_s3 + $0x170] ss:$12 sps:$4 sm:$0xff]  }
  0xe6   :  { %1804 = vmatprep.subr.bf16.mxu1 %v4976_v42  ;;  %v5052_v42 = vld [vmem:[%s6275_s3 + $0xc0] ss:$12 sps:$4 sm:$0xff]  }
  0xe8   :  { %2545 = vmatpush1.bf16.msra.mxu0 %v4986_v48 }
  0xe9   :  { %1805 = vmatpush2.bf16.msra.mxu1 %v4974_v43  ;;  %2546 = vmatprep.subr.bf16.mxu0 %v4991_v49  ;;  %v5055_v43 = vld [vmem:[%s6275_s3 + $0x2d0] ss:$12 sps:$4 sm:$0xff]   ;;  %v5058_v49 = vld [vmem:[%s6275_s3 + $0x2b8] ss:$12 sps:$4 sm:$0xff]  }
  0xea   :  { %1806 = vmatprep.subr.bf16.mxu1 %v4979_v44 }
  0xec   :  { %2547 = vmatpush1.bf16.msra.mxu0 %v4989_v50 }
  0xed   :  { %1807 = vmatpush2.bf16.msra.mxu1 %v4977_v45  ;;  %2548 = vmatprep.subr.bf16.mxu0 %v4994_v51  ;;  %v5063_v51 = vld [vmem:[%s6275_s3 + $0x2a0] ss:$12 sps:$4 sm:$0xff]  }
  0xee   :  { %2581 = vmatprep.subr.bf16.mxu1 %v5003_v57 }
  0xf0   :  { %1809 = vmatmul.mubr.bf16.vlgmr.msra.gmra.mxu1 %v5438_v9  ;;  %2549 = vmatpush1.bf16.msra.mxu0 %v4992_v52  ;;  %v4995_v9 = vld [vmem:[%s6275_s3 + $0x30] ss:$12 sps:$4 sm:$0xff]  }
  0xf1   :  { %2550 = vmatprep.subr.bf16.mxu0 %v4997_v54  ;;  %2582 = vmatpush1.bf16.msra.mxu1 %v5001_v56  ;;  %v5065_v52 = vld [vmem:[%s6275_s3 + $0x2a4] ss:$12 sps:$4 sm:$0xff]   ;;  %v5070_v56 = vld [vmem:[%s6275_s3 + $0x28c] ss:$12 sps:$4 sm:$0xff]  }
  0xf2   :  { %2583 = vmatprep.subr.bf16.mxu1 %v5009_v58 }
  0xf4   :  { %2551 = vmatpush1.bf16.msra.mxu0 %v4995_v9 }
  0xf5   :  { %2552 = vmatprep.subr.bf16.mxu0 %v5000_v55  ;;  %2584 = vmatpush1.bf16.msra.mxu1 %v5007_v60  ;;  %v5068_v55 = vld [vmem:[%s6275_s3 + $0x288] ss:$12 sps:$4 sm:$0xff]   ;;  %v5073_v60 = vld [vmem:[%s6275_s3 + $0x270] ss:$12 sps:$4 sm:$0xff]  }
  0xf6   :  { %2585 = vmatprep.subr.bf16.mxu1 %v5015_v62  ;;  %v5078_v62 = vld [vmem:[%s6275_s3 + $0x258] ss:$12 sps:$4 sm:$0xff]  }
  0xf8   :  { %2553 = vmatpush1.bf16.msra.mxu0 %v4998_v59  ;;  %v5075_v59 = vld [vmem:[%s6275_s3 + $0x274] ss:$12 sps:$4 sm:$0xff]  }
  0xf9   :  { %2554 = vmatprep.subr.bf16.mxu0 %v5006_v61  ;;  %2586 = vmatpush1.bf16.msra.mxu1 %v5013_v1  ;;  %v5080_v61 = vld [vmem:[%s6275_s3 + $0x25c] ss:$12 sps:$4 sm:$0xff]   ;;  %v5083_v1 = vld [vmem:[%s6275_s3 + $0x240] ss:$12 sps:$4 sm:$0xff]  }
  0xfa   :  { %2587 = vmatprep.subr.bf16.mxu1 %v5021_v3 }
  0xfc   :  { %2555 = vmatpush1.bf16.msra.mxu0 %v5004_v63  ;;  %v5085_v63 = vld [vmem:[%s6275_s3 + $0x244] ss:$12 sps:$4 sm:$0xff]  }
  0xfd   :  { %2556 = vmatprep.subr.bf16.mxu0 %v5012_v2  ;;  %2588 = vmatpush1.bf16.msra.mxu1 %v5019_v53  ;;  %v5089_v2 = vld [vmem:[%s6275_s3 + $0x2f0] ss:$12 sps:$4 sm:$0xff]  }
  0xfe   :  { %2589 = vmatprep.subr.bf16.mxu1 %v5027_v6 }
 0x100   :  { %2557 = vmatpush2.bf16.msra.mxu0 %v5010_v4 }
 0x101   :  { %2558 = vmatprep.subr.bf16.mxu0 %v5018_v5  ;;  %2590 = vmatpush1.bf16.msra.mxu1 %v5025_v8 }
 0x102   :  { %2591 = vmatprep.subr.bf16.mxu1 %v5033_v12 }
 0x104   :  { %2559 = vmatpush2.bf16.msra.mxu0 %v5016_v7 }
 0x105   :  { %2560 = vmatprep.subr.bf16.mxu0 %v5024_v10  ;;  %2592 = vmatpush1.bf16.msra.mxu1 %v5031_v14 }
 0x106   :  { %2593 = vmatprep.subr.bf16.mxu1 %v5039_v16 }
 0x108   :  { %2561 = vmatpush2.bf16.msra.mxu0 %v5022_v13 }
 0x109   :  { %2562 = vmatprep.subr.bf16.mxu0 %v5030_v15  ;;  %2594 = vmatpush1.bf16.msra.mxu1 %v5037_v18 }
 0x10a   :  { %2595 = vmatprep.subr.bf16.mxu1 %v5045_v28  ;;  %v1868_v28 = vlaneseq }
 0x10c   :  { %2563 = vmatpush2.bf16.msra.mxu0 %v5028_v17 }
 0x10d   :  { %2564 = vmatprep.subr.bf16.mxu0 %v5036_v19  ;;  %2596 = vmatpush1.bf16.msra.mxu1 %v5043_v31  ;;  %v1866_v31 = vld [vmem:[%s6274_s2] sm:$0xf] }
 0x10e   :  { %2597 = vmatprep.subr.bf16.mxu1 %v5051_v34 }
 0x10f   :  { %v1400_v20 = vpop.f32.mrf.mxu0 }
 0x110   :  { %v5590_v22 = vadd.f32 %v5460_v32, %v1400_v20  ;;  %2565 = vmatpush2.bf16.msra.mxu0 %v5034_v21 }
 0x111   :  { %v1402_v23 = vpop.f32.mrf.mxu0  ;;  %2566 = vmatprep.subr.bf16.mxu0 %v5042_v27  ;;  %2598 = vmatpush2.bf16.msra.mxu1 %v5049_v37 }
 0x112   :  { %v5593_v24 = vadd.f32 %v5463_v33, %v1402_v23  ;;  %v5048_v33 = vld [vmem:[%s6275_s3 + $0xdc] ss:$12 sps:$4 sm:$0xff]   ;;  %2599 = vmatprep.subr.bf16.mxu1 %v5057_v40 }
 0x113   :  { %v1404_v25 = vpop.f32.mrf.mxu0 }
 0x114   :  { %2567 = vmatpush2.bf16.msra.mxu0 %v5040_v30 }
 0x115   :  { %v1405_v26 = vpop.f32.mrf.mxu0  ;;  %2568 = vmatprep.subr.bf16.mxu0 %v5048_v33  ;;  %2600 = vmatpush2.bf16.msra.mxu1 %v5055_v43 }
 0x116   :  { %2601 = vmatprep.subr.bf16.mxu1 %v5060_v47 }
 0x118   :  { %v1482_v29 = vpop.f32.mrf.mxu1  ;;  %2569 = vmatpush2.bf16.msra.mxu0 %v5046_v36 }
 0x119   :  { %2570 = vmatprep.subr.bf16.mxu0 %v5054_v39  ;;  %2602 = vmatpush2.bf16.msra.mxu1 %v5058_v49 }
 0x11a   :  { %v1484_v32 = vpop.f32.mrf.mxu1  ;;  %2603 = vmatprep.subr.bf16.mxu1 %v5065_v52  ;;  %v5066_v52 = vld [vmem:[%s6275_s3 + $0x158] ss:$12 sps:$4 sm:$0xff]  }
 0x11c   :  { %v1486_v35 = vpop.f32.mrf.mxu1  ;;  %2571 = vmatpush2.bf16.msra.mxu0 %v5052_v42 }
 0x11d   :  { %4515 = vmatprep.subr.bf16.mxu0 %v5061_v11  ;;  %2604 = vmatpush2.bf16.msra.mxu1 %v5063_v51 }
 0x11e   :  { %v1487_v38 = vpop.f32.mrf.mxu1  ;;  %2605 = vmatprep.subr.bf16.mxu1 %v5070_v56  ;;  %v5071_v56 = vld [vmem:[%s6275_s3 + $0x140] ss:$12 sps:$4 sm:$0xff]  }
 0x120   :  { %v1523_v41 = vpop.f32.mrf.mxu1 }
 0x121   :  { %v5631_v44 = vadd.f32 %v1523_v41, %v1482_v29  ;;  %2606 = vmatpush2.bf16.msra.mxu1 %v5068_v55  ;;  %v5684_v29 = vshrl.u32 %v1868_v28, 7  ;;  %v5067_v55 = vld [vmem:[%s6275_s3 + $0x98] ss:$12 sps:$4 sm:$0xff]   ;;  %v5098_v28 = vld [vmem:[%s6275_s3 + $0x2a8] ss:$12 sps:$4 sm:$0xff]  }
 0x122   :  { %v1525_v45 = vpop.f32.mrf.mxu1  ;;  %2607 = vmatprep.subr.bf16.mxu1 %v5075_v59 }
 0x123   :  { %v5633_v46 = vadd.f32 %v1525_v45, %v1484_v32  ;;  %v5687_v30 = vsub.s32 0, %v5684_v29  ;;  %v5693_v32 = vsub.s32 1, %v5684_v29  ;;  %v5719_v59 = vsub.s32 2, %v5684_v29 }
 0x124   :  { %v1527_v48 = vpop.f32.mrf.mxu1 }
 0x125   :  { %2608 = vmatpush2.bf16.msra.mxu1 %v5073_v60  ;;  %v1871_v35 = vrot.slane %v1866_v31, %v5687_v30  ;;  %v1875_v39 = vrot.slane %v1866_v31, %v5693_v32  ;;  %v1882_v60 = vsub.s32 3, %v5684_v29  ;;  %v5266_v29 = vld [vmem:[%s6283_s11 + $0xb0] ss:$12 sps:$4 sm:$0xff]  }
 0x126   :  { %v1528_v50 = vpop.f32.mrf.mxu1  ;;  %2609 = vmatprep.subr.bf16.mxu1 %v5080_v61  ;;  %v5077_v61 = vld [vmem:[%s6275_s3 + $0x68] ss:$12 sps:$4 sm:$0xff]  }
 0x127   :  { %v5062_v50 = vld [vmem:[%s6275_s3 + $0xb0] ss:$12 sps:$4 sm:$0xff]  }
 0x128   :  { %v1605_v9 = vpop.f32.mrf.mxu1 }
 0x129   :  { %2610 = vmatpush2.bf16.msra.mxu1 %v5078_v62 }
 0x12a   :  { %v1607_v54 = vpop.f32.mrf.mxu1  ;;  %2611 = vmatprep.subr.bf16.mxu1 %v5085_v63  ;;  %v5081_v63 = vld [vmem:[%s6275_s3 + $0x110] ss:$12 sps:$4 sm:$0xff]  }
 0x12c   :  { %v1609_v57 = vpop.f32.mrf.mxu1 }
 0x12d   :  { %2612 = vmatpush2.bf16.msra.mxu1 %v5083_v1  ;;  %v5072_v57 = vld [vmem:[%s6275_s3 + $0x80] ss:$12 sps:$4 sm:$0xff]  }
 0x12e   :  { %v1610_v58 = vpop.f32.mrf.mxu1  ;;  %4537 = vmatprep.subr.bf16.mxu1 %v5089_v2  ;;  %v1879_v2 = vrot.slane %v1866_v31, %v5719_v59 }
 0x12f   :  { %v5076_v58 = vld [vmem:[%s6275_s3 + $0x128] ss:$12 sps:$4 sm:$0xff]  }
 0x14f   :  { %v1564_v3 = vpop.f32.mrf.mxu0 }
 0x150   :  { %v1606_v4 = vadd.f32 %v1605_v9, %v1564_v3 }
 0x151   :  { %v1566_v53 = vpop.f32.mrf.mxu0 }
 0x152   :  { %v1858_v5 = vmax.f32 %v5590_v22, %v1606_v4  ;;  %v1608_v6 = vadd.f32 %v1607_v54, %v1566_v53 }
 0x153   :  { %v1568_v7 = vpop.f32.mrf.mxu0 }
 0x154   :  { %v1859_v8 = vmax.f32 %v5593_v24, %v1608_v6  ;;  %v5082_v6 = vld [vmem:[%s6275_s3 + $0x50] ss:$12 sps:$4 sm:$0xff]  }
 0x155   :  { %v1569_v10 = vpop.f32.mrf.mxu0 }
 0x157   :  { %v1687_v12 = vpop.f32.mrf.mxu0 }
 0x159   :  { %v1689_v13 = vpop.f32.mrf.mxu0 }
 0x15b   :  { %v1691_v14 = vpop.f32.mrf.mxu0 }
 0x15d   :  { %v1692_v15 = vpop.f32.mrf.mxu0 }
 0x15e   :  { %v5087_v15 = vld [vmem:[%s6275_s3 + $0x38] ss:$12 sps:$4 sm:$0xff]  }
 0x168   :  { %v1646_v16 = vpop.f32.mrf.mxu1 }
 0x169   :  { %v1688_v17 = vadd.f32 %v1687_v12, %v1646_v16 }
 0x16a   :  { %v1648_v18 = vpop.f32.mrf.mxu1 }
 0x16b   :  { %v1860_v19 = vmax.f32 %v5631_v44, %v1688_v17  ;;  %v5680_v20 = vadd.f32 %v1689_v13, %v1648_v18  ;;  %v5088_v17 = vld [vmem:[%s6275_s3 + $0xe0] ss:$12 sps:$4 sm:$0xff]  }
 0x16c   :  { %v1650_v21 = vpop.f32.mrf.mxu1 }
 0x16d   :  { %v1861_v22 = vmax.f32 %v5633_v46, %v5680_v20  ;;  %v5090_v46 = vld [vmem:[%s6275_s3 + $0x20] ss:$12 sps:$4 sm:$0xff]   ;;  %v5091_v20 = vld [vmem:[%s6275_s3 + $0x230] ss:$12 sps:$4 sm:$0xff]  }
 0x16e   :  { %v1651_v23 = vpop.f32.mrf.mxu1 }
 0x16f   :  { %v5093_v23 = vld [vmem:[%s6275_s3 + $0x2d8] ss:$12 sps:$4 sm:$0xff]  }
 0x170   :  { %v1769_v25 = vpop.f32.mrf.mxu1 }
 0x172   :  { %v1771_v26 = vpop.f32.mrf.mxu1 }
 0x174   :  { %v1773_v24 = vpop.f32.mrf.mxu1 }
 0x175   :  { %v5096_v24 = vld [vmem:[%s6275_s3 + $0x2c0] ss:$12 sps:$4 sm:$0xff]  }
 0x176   :  { %v1774_v27 = vpop.f32.mrf.mxu1 }
 0x177   :  { %v5097_v27 = vld [vmem:[%s6275_s3 + $0x200] ss:$12 sps:$4 sm:$0xff]  }
 0x197   :  { %v1728_v33 = vpop.f32.mrf.mxu0 }
 0x198   :  { %v1770_v34 = vadd.f32 %v1769_v25, %v1728_v33  ;;  %v5094_v25 = vld [vmem:[%s6275_s3 + $0x8] ss:$12 sps:$4 sm:$0xff]   ;;  %v5100_v33 = vld [vmem:[%s6275_s3 + $0x290] ss:$12 sps:$4 sm:$0xff]  }
 0x199   :  { %v1730_v36 = vpop.f32.mrf.mxu0 }
 0x19a   :  { %v1862_v37 = vmax.f32 %v1858_v5, %v1770_v34  ;;  %v1772_v38 = vadd.f32 %v1771_v26, %v1730_v36  ;;  %v1883_v5 = vrot.slane %v1866_v31, %v1882_v60  ;;  %v5095_v26 = vld [vmem:[%s6275_s3 + $0x218] ss:$12 sps:$4 sm:$0xff]   ;;  %v5099_v31 = vld [vmem:[%s6275_s3 + $0x1e8] ss:$12 sps:$4 sm:$0xff]   ;;  %v5101_v34 = vld [vmem:[%s6275_s3 + $0x1d0] ss:$12 sps:$4 sm:$0xff]  }
 0x19b   :  { %v1732_v40 = vpop.f32.mrf.mxu0  ;;  %v5103_v36 = vld [vmem:[%s6275_s3 + $0x1b8] ss:$12 sps:$4 sm:$0xff]  }
 0x19c   :  { %v1888_v41 = vadd.f32 %v1871_v35, %v1862_v37  ;;  %v1863_v42 = vmax.f32 %v1859_v8, %v1772_v38  ;;  %v5086_v8 = vld [vmem:[%s6275_s3 + $0xf8] ss:$12 sps:$4 sm:$0xff]   ;;  %v5104_v37 = vld [vmem:[%s6275_s3 + $0x260] ss:$12 sps:$4 sm:$0xff]   ;;  %v5107_v40 = vld [vmem:[%s6275_s3 + $0x188] ss:$12 sps:$4 sm:$0xff]  }
 0x19d   :  { %v1733_v43 = vpop.f32.mrf.mxu0  ;;  %v5102_v35 = vld [vmem:[%s6275_s3 + $0x278] ss:$12 sps:$4 sm:$0xff]   ;;  %v5105_v38 = vld [vmem:[%s6275_s3 + $0x1a0] ss:$12 sps:$4 sm:$0xff]  }
 0x19e   :  { %v1889_v44 = vadd.f32 %v1875_v39, %v1863_v42  ;;  %v1892_v45 = vmax.f32 %v1888_v41, 0.0  ;;  %v5106_v39 = vld [vmem:[%s6275_s3 + $0x248] ss:$12 sps:$4 sm:$0xff]   ;;  %v5108_v41 = vld [vmem:[%s6277_s5 + $0x38] sm:$0xff]   ;;  %v5344_v42 = vmov 0.0  }
 0x19f   :  { %v1851_v47 = vpop.f32.mrf.mxu0  ;;  %v5109_v43 = vld [vmem:[%s6277_s5 + $0x30] sm:$0xff]  }
 0x1a0   :  { %v1893_v11 = vmax.f32 %v1889_v44, 0.0  ;;  %v5700_v51 = vpack.c.bf16 %v1892_v45, %v1892_v45  ;;  %v5110_v44 = vld [vmem:[%s6277_s5 + $0x28] sm:$0xff]   ;;  %v5111_v45 = vld [vmem:[%s6277_s5 + $0x20] sm:$0xff]  }
 0x1a1   :  { %v1853_v48 = vpop.f32.mrf.mxu0 }
 0x1a2   :  { %v1897_v49 = vpack.c.bf16 %v1893_v11, %v1893_v11  ;;  %v5113_v11 = vld [vmem:[%s6277_s5 + $0x10] sm:$0xff]  }
 0x1a3   :  { %v1855_v9 = vpop.f32.mrf.mxu0 }
 0x1a4   :  { %2572 = vmatprep.mubr.bf16.mxu0 %v1897_v49 }
 0x1a5   :  { %2573 = vmatmul.mubr.bf16.vlgmr.msra.gmra.mxu0 %v5700_v51  ;;  %v1856_v54 = vpop.f32.mrf.mxu0 }
 0x1a6   :  { %4516 = vmatpush3.bf16.msra.mxu0 %v5062_v50  ;;  %2654 = vmatprep.mubr.bf16.mxu0 %v1897_v49  ;;  %v5115_v49 = vld [vmem:[%s6277_s5] sm:$0xff]   ;;  %v5116_v50 = vld [vmem:[%s6279_s7 + $0x18] sm:$0xff]  }
 0x1a7   :  { %4517 = vmatprep.subr.bf16.mxu0 %v5066_v52 }
 0x1aa   :  { %4518 = vmatpush3.bf16.msra.mxu0 %v5067_v55 }
 0x1ab   :  { %4519 = vmatprep.subr.bf16.mxu0 %v5071_v56 }
 0x1ae   :  { %4520 = vmatpush3.bf16.msra.mxu0 %v5072_v57 }
 0x1af   :  { %4521 = vmatprep.subr.bf16.mxu0 %v5076_v58 }
 0x1b0   :  { %v1810_v62 = vpop.f32.mrf.mxu1 }
 0x1b1   :  { %v1852_v1 = vadd.f32 %v1851_v47, %v1810_v62  ;;  %v5112_v47 = vld [vmem:[%s6277_s5 + $0x18] sm:$0xff]  }
 0x1b2   :  { %v1812_v3 = vpop.f32.mrf.mxu1  ;;  %4522 = vmatpush3.bf16.msra.mxu0 %v5077_v61 }
 0x1b3   :  { %v1864_v4 = vmax.f32 %v1860_v19, %v1852_v1  ;;  %v1854_v53 = vadd.f32 %v1853_v48, %v1812_v3  ;;  %4523 = vmatprep.subr.bf16.mxu0 %v5081_v63  ;;  %v5114_v48 = vld [vmem:[%s6277_s5 + $0x8] sm:$0xff]  }
 0x1b4   :  { %v1814_v7 = vpop.f32.mrf.mxu1 }
 0x1b5   :  { %v1890_v10 = vadd.f32 %v1879_v2, %v1864_v4  ;;  %v1865_v12 = vmax.f32 %v1861_v22, %v1854_v53  ;;  %v5092_v22 = vld [vmem:[%s6275_s3 + $0xc8] ss:$12 sps:$4 sm:$0xff]  }
 0x1b6   :  { %v1815_v13 = vpop.f32.mrf.mxu1  ;;  %4524 = vmatpush3.bf16.msra.mxu0 %v5082_v6 }
 0x1b7   :  { %v1891_v14 = vadd.f32 %v1883_v5, %v1865_v12  ;;  %v1894_v16 = vmax.f32 %v1890_v10, 0.0  ;;  %4525 = vmatprep.subr.bf16.mxu0 %v5086_v8  ;;  %v4371_v13 = vld [vmem:[%s6276_s4] ss:$0 sm:$0xff] }
 0x1b9   :  { %v1895_v18 = vmax.f32 %v1891_v14, 0.0  ;;  %v1898_v21 = vpack.c.bf16 %v1894_v16, %v1894_v16 }
 0x1ba   :  { %4526 = vmatpush3.bf16.msra.mxu0 %v5087_v15 }
 0x1bb   :  { %v1899_v19 = vpack.c.bf16 %v1895_v18, %v1895_v18  ;;  %4527 = vmatprep.subr.bf16.mxu0 %v5088_v17 }
 0x1bd   :  { %2613 = vmatprep.mubr.bf16.mxu1 %v1899_v19 }
 0x1be   :  { %2614 = vmatmul.mubr.bf16.vlgmr.msra.gmra.mxu1 %v1898_v21  ;;  %4528 = vmatpush3.bf16.msra.mxu0 %v5090_v46  ;;  %v5119_v46 = vld [vmem:[%s6279_s7] sm:$0xff]  }
 0x1bf   :  { %4538 = vmatpush3.bf16.msra.mxu1 %v5091_v20  ;;  %2694 = vmatprep.mubr.bf16.mxu1 %v1899_v19  ;;  %v5118_v19 = vld [vmem:[%s6279_s7 + $0x8] sm:$0xff]   ;;  %v5122_v20 = vld [vmem:[%s6281_s9 + $0xe4] ss:$16 sps:$4 sm:$0xff]  }
 0x1c0   :  { %4529 = vmatprep.subr.bf16.mxu0 %v5092_v22  ;;  %4539 = vmatprep.subr.bf16.mxu1 %v5093_v23  ;;  %v5125_v22 = vld [vmem:[%s6281_s9 + $0xec] ss:$16 sps:$4 sm:$0xff]  }
 0x1c1   :  { %v5131_v23 = vld [vmem:[%s6281_s9 + $0xcc] ss:$16 sps:$4 sm:$0xff]  }
 0x1c2   :  { %4530 = vmatpush3.bf16.msra.mxu0 %v5094_v25  ;;  %v5129_v25 = vld [vmem:[%s6281_s9 + $0xc8] ss:$16 sps:$4 sm:$0xff]  }
 0x1c3   :  { %4540 = vmatpush3.bf16.msra.mxu1 %v5095_v26  ;;  %4617 = vmatprep.subr.bf16.mxu0 %v5344_v42  ;;  %v5137_v26 = vld [vmem:[%s6281_s9 + $0xac] ss:$16 sps:$4 sm:$0xff]  }
 0x1c4   :  { %4541 = vmatprep.subr.bf16.mxu1 %v5096_v24  ;;  %v5135_v24 = vld [vmem:[%s6281_s9 + $0xa8] ss:$16 sps:$4 sm:$0xff]  }
 0x1c5   :  { %2655 = vmatmul.mubr.bf16.vlgmr.msra.gmra.mxu0 %v5700_v51  ;;  %v5117_v51 = vld [vmem:[%s6279_s7 + $0x10] sm:$0xff]  }
 0x1c6   :  { %4618 = vmatpush3.bf16.msra.mxu0 %v5108_v41  ;;  %4633 = vmatprep.mubr.msk.bf16.mxu0 %vm5345_vm1, %v5344_v42 }
 0x1c7   :  { %4542 = vmatpush3.bf16.msra.mxu1 %v5097_v27  ;;  %4619 = vmatprep.subr.bf16.mxu0 %v5344_v42  ;;  %v5143_v27 = vld [vmem:[%s6281_s9 + $0x8c] ss:$16 sps:$4 sm:$0xff]  }
 0x1c8   :  { %4543 = vmatprep.subr.bf16.mxu1 %v5098_v28  ;;  %v5141_v28 = vld [vmem:[%s6281_s9 + $0x88] ss:$16 sps:$4 sm:$0xff]  }
 0x1ca   :  { %4620 = vmatpush3.bf16.msra.mxu0 %v5109_v43 }
 0x1cb   :  { %4544 = vmatpush3.bf16.msra.mxu1 %v5099_v31  ;;  %4621 = vmatprep.subr.bf16.mxu0 %v5344_v42  ;;  %v5149_v31 = vld [vmem:[%s6281_s9 + $0x6c] ss:$16 sps:$4 sm:$0xff]  }
 0x1cc   :  { %4545 = vmatprep.subr.bf16.mxu1 %v5100_v33  ;;  %v5147_v33 = vld [vmem:[%s6281_s9 + $0x68] ss:$16 sps:$4 sm:$0xff]  }
 0x1ce   :  { %4622 = vmatpush3.bf16.msra.mxu0 %v5110_v44  ;;  %v5120_v44 = vld [vmem:[%s6281_s9 + $0xe0] ss:$16 sps:$4 sm:$0xff]  }
 0x1cf   :  { %4546 = vmatpush3.bf16.msra.mxu1 %v5101_v34  ;;  %4623 = vmatprep.subr.bf16.mxu0 %v5344_v42  ;;  %v5155_v34 = vld [vmem:[%s6281_s9 + $0x4c] ss:$16 sps:$4 sm:$0xff]  }
 0x1d0   :  { %4547 = vmatprep.subr.bf16.mxu1 %v5102_v35  ;;  %v5153_v35 = vld [vmem:[%s6281_s9 + $0x48] ss:$16 sps:$4 sm:$0xff]  }
 0x1d2   :  { %4624 = vmatpush3.bf16.msra.mxu0 %v5111_v45 }
 0x1d3   :  { %4548 = vmatpush3.bf16.msra.mxu1 %v5103_v36  ;;  %4625 = vmatprep.subr.bf16.mxu0 %v5344_v42  ;;  %v5161_v36 = vld [vmem:[%s6281_s9 + $0x2c] ss:$16 sps:$4 sm:$0xff]  }
 0x1d4   :  { %4549 = vmatprep.subr.bf16.mxu1 %v5104_v37  ;;  %v5159_v37 = vld [vmem:[%s6281_s9 + $0x28] ss:$16 sps:$4 sm:$0xff]  }
 0x1d6   :  { %4626 = vmatpush3.bf16.msra.mxu0 %v5112_v47  ;;  %v5128_v47 = vld [vmem:[%s6281_s9 + $0xc4] ss:$16 sps:$4 sm:$0xff]  }
 0x1d7   :  { %4550 = vmatpush3.bf16.msra.mxu1 %v5105_v38  ;;  %4627 = vmatprep.subr.bf16.mxu0 %v5344_v42  ;;  %v4372_v38 = vld [vmem:[%s6278_s6] ss:$0 sm:$0xff] }
 0x1d8   :  { %4551 = vmatprep.subr.bf16.mxu1 %v5106_v39 }
 0x1da   :  { %4628 = vmatpush3.bf16.msra.mxu0 %v5113_v11 }
 0x1db   :  { %4552 = vmatpush3.bf16.msra.mxu1 %v5107_v40  ;;  %4629 = vmatprep.subr.bf16.mxu0 %v5344_v42 }
 0x1dc   :  { %4637 = vmatprep.subr.bf16.mxu1 %v5344_v42 }
 0x1de   :  { %2695 = vmatmul.mubr.bf16.vlgmr.msra.gmra.mxu1 %v1898_v21  ;;  %4630 = vmatpush3.bf16.msra.mxu0 %v5114_v48  ;;  %v5123_v21 = vld [vmem:[%s6281_s9 + $0xe8] ss:$16 sps:$4 sm:$0xff]   ;;  %v5126_v48 = vld [vmem:[%s6281_s9 + $0xc0] ss:$16 sps:$4 sm:$0xff]  }
 0x1df   :  { %4631 = vmatprep.subr.bf16.mxu0 %v5344_v42  ;;  %4645 = vmatprep.mubr.msk.bf16.mxu1 %vm5345_vm1, %v5344_v42 }
 0x1e0   :  { %4638 = vmatpush3.bf16.msra.mxu1 %v5116_v50  ;;  %v5132_v50 = vld [vmem:[%s6281_s9 + $0xa0] ss:$16 sps:$4 sm:$0xff]  }
 0x1e1   :  { %4639 = vmatprep.subr.bf16.mxu1 %v5344_v42 }
 0x1e2   :  { %4632 = vmatpush3.bf16.msra.mxu0 %v5115_v49  ;;  %v5134_v49 = vld [vmem:[%s6281_s9 + $0xa4] ss:$16 sps:$4 sm:$0xff]  }
 0x1e3   :  { %3167 = vmatprep.subr.bf16.mxu0 %v5125_v22  ;;  %v5191_v22 = vld [vmem:[%s6283_s11 + $0x1e4] ss:$12 sps:$4 sm:$0xff]  }
 0x1e4   :  { %4640 = vmatpush3.bf16.msra.mxu1 %v5117_v51  ;;  %v5140_v51 = vld [vmem:[%s6281_s9 + $0x84] ss:$16 sps:$4 sm:$0xff]  }
 0x1e5   :  { %4641 = vmatprep.subr.bf16.mxu1 %v5344_v42 }
 0x1e8   :  { %4642 = vmatpush3.bf16.msra.mxu1 %v5118_v19  ;;  %v5185_v19 = vld [vmem:[%s6283_s11 + $0x1fc] ss:$12 sps:$4 sm:$0xff]  }
 0x1e9   :  { %4643 = vmatprep.subr.bf16.mxu1 %v5344_v42 }
 0x1ec   :  { %4644 = vmatpush3.bf16.msra.mxu1 %v5119_v46  ;;  %v5180_v46 = vld [vmem:[%s6283_s11 + $0x78] ss:$12 sps:$4 sm:$0xff]  }
 0x1ed   :  { %3126 = vmatprep.subr.bf16.mxu1 %v5122_v20  ;;  %v5183_v20 = vld [vmem:[%s6283_s11 + $0x1f8] ss:$12 sps:$4 sm:$0xff]  }
 0x265   :  { %v2574_v52 = vpop.f32.mrf.mxu0 }
 0x267   :  { %v2576_v9 = vpop.f32.mrf.mxu0 }
 0x269   :  { %v2578_v54 = vpop.f32.mrf.mxu0 }
 0x26a   :  { %v5152_v54 = vld [vmem:[%s6281_s9 + $0x44] ss:$16 sps:$4 sm:$0xff]  }
 0x26b   :  { %v2579_v55 = vpop.f32.mrf.mxu0 }
 0x26c   :  { %v5150_v55 = vld [vmem:[%s6281_s9 + $0x40] ss:$16 sps:$4 sm:$0xff]  }
 0x27e   :  { %v2615_v56 = vpop.f32.mrf.mxu1 }
 0x27f   :  { %v2616_v5 = vadd.f32 %v2615_v56, %v2574_v52  ;;  %v5146_v52 = vld [vmem:[%s6281_s9 + $0x64] ss:$16 sps:$4 sm:$0xff]  }
 0x280   :  { %v2617_v57 = vpop.f32.mrf.mxu1  ;;  %v5158_v56 = vld [vmem:[%s6281_s9 + $0x24] ss:$16 sps:$4 sm:$0xff]  }
 0x281   :  { %v2618_v4 = vadd.f32 %v2617_v57, %v2576_v9  ;;  %v5144_v9 = vld [vmem:[%s6281_s9 + $0x60] ss:$16 sps:$4 sm:$0xff]  }
 0x282   :  { %v2619_v58 = vpop.f32.mrf.mxu1  ;;  %v5156_v57 = vld [vmem:[%s6281_s9 + $0x20] ss:$16 sps:$4 sm:$0xff]  }
 0x283   :  { %v2702_v10 = vmax.f32 %v2616_v5, %v2618_v4  ;;  %v5164_v58 = vld [vmem:[%s6281_s9 + $0x4] ss:$16 sps:$4 sm:$0xff]  }
 0x284   :  { %v2620_v61 = vpop.f32.mrf.mxu1 }
 0x285   :  { %v4531_v62 = vpop.f32.mrf.mxu0  ;;  %v5167_v61 = vld [vmem:[%s6281_s9 + $0xc] ss:$16 sps:$4 sm:$0xff]  }
 0x287   :  { %v4532_v63 = vpop.f32.mrf.mxu0 }
 0x288   :  { %v4533_v6 = vadd.f32 %v4532_v63, %v4531_v62  ;;  %v5162_v62 = vld [vmem:[%s6281_s9] ss:$16 sps:$4 sm:$0xff]   ;;  %v5165_v63 = vld [vmem:[%s6281_s9 + $0x8] ss:$16 sps:$4 sm:$0xff]  }
 0x289   :  { %v4534_v1 = vpop.f32.mrf.mxu0 }
 0x28a   :  { %v5170_v1 = vld [vmem:[%s6283_s11 + $0xac] ss:$12 sps:$4 sm:$0xff]  }
 0x28b   :  { %v4535_v2 = vpop.f32.mrf.mxu0 }
 0x28c   :  { %v5173_v2 = vld [vmem:[%s6283_s11 + $0x22c] ss:$12 sps:$4 sm:$0xff]  }
 0x29e   :  { %v4553_v3 = vpop.f32.mrf.mxu1 }
 0x2a0   :  { %v4554_v53 = vpop.f32.mrf.mxu1 }
 0x2a1   :  { %v4555_v7 = vadd.f32 %v4554_v53, %v4553_v3  ;;  %v4381_v3 = vld [vmem:[%s6280_s8] ss:$0 sm:$0xff] }
 0x2a2   :  { %v4556_v8 = vpop.f32.mrf.mxu1 }
 0x2a3   :  { %v2697_v12 = vadd.f32 %v4555_v7, %v4533_v6  ;;  %v5168_v8 = vld [vmem:[%s6283_s11 + $0xa8] ss:$12 sps:$4 sm:$0xff]  }
 0x2a4   :  { %v4557_v14 = vpop.f32.mrf.mxu1 }
 0x2a5   :  { %v2703_v15 = vmax.f32 %v2702_v10, %v2697_v12  ;;  %v5171_v10 = vld [vmem:[%s6283_s11 + $0x228] ss:$12 sps:$4 sm:$0xff]  }
 0x2a6   :  { %v5179_v14 = vld [vmem:[%s6283_s11 + $0x214] ss:$12 sps:$4 sm:$0xff]  }
 0x2a7   :  { %v2711_v16 = vadd.f32 %v4371_v13, %v2703_v15  ;;  %v5176_v13 = vld [vmem:[%s6283_s11 + $0x94] ss:$12 sps:$4 sm:$0xff]  }
 0x2a9   :  { %v2712_v17 = vmax.f32 %v2711_v16, 0.0  ;;  %v5174_v16 = vld [vmem:[%s6283_s11 + $0x90] ss:$12 sps:$4 sm:$0xff]  }
 0x2ab   :  { %v2713_v18 = vpack.c.bf16 %v2712_v17, %v2712_v17  ;;  %v5177_v17 = vld [vmem:[%s6283_s11 + $0x210] ss:$12 sps:$4 sm:$0xff]  }
 0x2ad   :  { %4634 = vmatmul.mubr.bf16.vlgmr.msra.gmra.mxu0 %v2713_v18  ;;  %v5182_v18 = vld [vmem:[%s6283_s11 + $0x7c] ss:$12 sps:$4 sm:$0xff]  }
 0x2ae   :  { %3199 = vmatprep.mubr.bf16.mxu0 %v5343_v0  ;;  %3168 = vmatpush1.bf16.msra.mxu0 %v5123_v21  ;;  %v5188_v21 = vld [vmem:[%s6283_s11 + $0x64] ss:$12 sps:$4 sm:$0xff]  }
 0x2af   :  { %3169 = vmatprep.subr.bf16.mxu0 %v5131_v23  ;;  %v5186_v23 = vld [vmem:[%s6283_s11 + $0x60] ss:$12 sps:$4 sm:$0xff]  }
 0x2b2   :  { %3170 = vmatpush1.bf16.msra.mxu0 %v5129_v25  ;;  %v5189_v25 = vld [vmem:[%s6283_s11 + $0x1e0] ss:$12 sps:$4 sm:$0xff]  }
 0x2b3   :  { %3171 = vmatprep.subr.bf16.mxu0 %v5137_v26  ;;  %v5194_v26 = vld [vmem:[%s6283_s11 + $0x4c] ss:$12 sps:$4 sm:$0xff]  }
 0x2b6   :  { %3172 = vmatpush1.bf16.msra.mxu0 %v5135_v24  ;;  %v5197_v24 = vld [vmem:[%s6283_s11 + $0x1cc] ss:$12 sps:$4 sm:$0xff]  }
 0x2b7   :  { %3173 = vmatprep.subr.bf16.mxu0 %v5143_v27  ;;  %v5192_v27 = vld [vmem:[%s6283_s11 + $0x48] ss:$12 sps:$4 sm:$0xff]  }
 0x2ba   :  { %3174 = vmatpush1.bf16.msra.mxu0 %v5141_v28  ;;  %v5195_v28 = vld [vmem:[%s6283_s11 + $0x1c8] ss:$12 sps:$4 sm:$0xff]  }
 0x2bb   :  { %3175 = vmatprep.subr.bf16.mxu0 %v5149_v31  ;;  %v5200_v31 = vld [vmem:[%s6283_s11 + $0x34] ss:$12 sps:$4 sm:$0xff]  }
 0x2be   :  { %3176 = vmatpush1.bf16.msra.mxu0 %v5147_v33  ;;  %v5203_v33 = vld [vmem:[%s6283_s11 + $0x1b4] ss:$12 sps:$4 sm:$0xff]  }
 0x2bf   :  { %3177 = vmatprep.subr.bf16.mxu0 %v5155_v34  ;;  %v5198_v34 = vld [vmem:[%s6283_s11 + $0x30] ss:$12 sps:$4 sm:$0xff]  }
 0x2c2   :  { %3178 = vmatpush1.bf16.msra.mxu0 %v5153_v35  ;;  %v5201_v35 = vld [vmem:[%s6283_s11 + $0x1b0] ss:$12 sps:$4 sm:$0xff]  }
 0x2c3   :  { %3179 = vmatprep.subr.bf16.mxu0 %v5161_v36  ;;  %v5206_v36 = vld [vmem:[%s6283_s11 + $0x1c] ss:$12 sps:$4 sm:$0xff]  }
 0x2c6   :  { %3180 = vmatpush1.bf16.msra.mxu0 %v5159_v37  ;;  %v5209_v37 = vld [vmem:[%s6283_s11 + $0x19c] ss:$12 sps:$4 sm:$0xff]  }
 0x2c7   :  { %3181 = vmatprep.subr.bf16.mxu0 %v5167_v61  ;;  %v5242_v61 = vld [vmem:[%s6283_s11 + $0x10c] ss:$12 sps:$4 sm:$0xff]  }
 0x2ca   :  { %3182 = vmatpush1.bf16.msra.mxu0 %v5165_v63  ;;  %v5240_v63 = vld [vmem:[%s6283_s11 + $0x108] ss:$12 sps:$4 sm:$0xff]  }
 0x2cb   :  { %3914 = vmatprep.subr.bf16.mxu0 %v5173_v2  ;;  %v5248_v2 = vld [vmem:[%s6283_s11 + $0xf4] ss:$12 sps:$4 sm:$0xff]  }
 0x36d   :  { %v2819_v39 = vpop.f32.mrf.mxu0 }
 0x36e   :  { %v2820_v40 = vadd.f32 %v4372_v38, %v2819_v39  ;;  %v5204_v38 = vld [vmem:[%s6283_s11 + $0x18] ss:$12 sps:$4 sm:$0xff]  }
 0x36f   :  { %v4635_v41 = vpop.f32.mrf.mxu0  ;;  %v5207_v39 = vld [vmem:[%s6283_s11 + $0x198] ss:$12 sps:$4 sm:$0xff]  }
 0x370   :  { %v2825_v42 = vmax.f32 %v2820_v40, 0.0  ;;  %v5212_v40 = vld [vmem:[%s6283_s11 + $0x4] ss:$12 sps:$4 sm:$0xff]  }
 0x371   :  { %v2822_v43 = vpop.f32.mrf.mxu0  ;;  %v5215_v41 = vld [vmem:[%s6283_s11 + $0x184] ss:$12 sps:$4 sm:$0xff]  }
 0x372   :  { %v2826_v45 = vpack.c.bf16 %v2825_v42, %v2825_v42  ;;  %v5210_v42 = vld [vmem:[%s6283_s11] ss:$12 sps:$4 sm:$0xff]  }
 0x373   :  { %v4636_v11 = vpop.f32.mrf.mxu0  ;;  %v5213_v43 = vld [vmem:[%s6283_s11 + $0x180] ss:$12 sps:$4 sm:$0xff]  }
 0x374   :  { %4646 = vmatmul.mubr.msk.bf16.vlgmr.msra.gmra.mxu1 %vm2866_vm2, %v2826_v45  ;;  %v5221_v45 = vld [vmem:[%s6283_s11 + $0x2ec] ss:$12 sps:$4 sm:$0xff]   ;;  %v5219_v11 = vld [vmem:[%s6283_s11 + $0x2e8] ss:$12 sps:$4 sm:$0xff]  }
 0x375   :  { %3127 = vmatpush1.bf16.msra.mxu1 %v5120_v44  ;;  %3158 = vmatprep.mubr.bf16.mxu1 %v5343_v0  ;;  %v5138_v0 = vld [vmem:[%s6281_s9 + $0x80] ss:$16 sps:$4 sm:$0xff]   ;;  %v5218_v44 = vld [vmem:[%s6283_s11 + $0x16c] ss:$12 sps:$4 sm:$0xff]  }
 0x376   :  { %3128 = vmatprep.subr.bf16.mxu1 %v5128_v47  ;;  %v5216_v47 = vld [vmem:[%s6283_s11 + $0x168] ss:$12 sps:$4 sm:$0xff]  }
 0x379   :  { %3129 = vmatpush1.bf16.msra.mxu1 %v5126_v48  ;;  %v5224_v48 = vld [vmem:[%s6283_s11 + $0x154] ss:$12 sps:$4 sm:$0xff]  }
 0x37a   :  { %3130 = vmatprep.subr.bf16.mxu1 %v5134_v49  ;;  %v5227_v49 = vld [vmem:[%s6283_s11 + $0x2d4] ss:$12 sps:$4 sm:$0xff]  }
 0x37d   :  { %3131 = vmatpush1.bf16.msra.mxu1 %v5132_v50  ;;  %v5222_v50 = vld [vmem:[%s6283_s11 + $0x150] ss:$12 sps:$4 sm:$0xff]  }
 0x37e   :  { %3132 = vmatprep.subr.bf16.mxu1 %v5140_v51  ;;  %v5225_v51 = vld [vmem:[%s6283_s11 + $0x2d0] ss:$12 sps:$4 sm:$0xff]  }
 0x381   :  { %3133 = vmatpush1.bf16.msra.mxu1 %v5138_v0  ;;  %v5230_v0 = vld [vmem:[%s6283_s11 + $0x13c] ss:$12 sps:$4 sm:$0xff]  }
 0x382   :  { %3134 = vmatprep.subr.bf16.mxu1 %v5146_v52  ;;  %v5233_v52 = vld [vmem:[%s6283_s11 + $0x2bc] ss:$12 sps:$4 sm:$0xff]  }
 0x385   :  { %3135 = vmatpush1.bf16.msra.mxu1 %v5144_v9  ;;  %v5228_v9 = vld [vmem:[%s6283_s11 + $0x138] ss:$12 sps:$4 sm:$0xff]  }
 0x386   :  { %3136 = vmatprep.subr.bf16.mxu1 %v5152_v54  ;;  %v5231_v54 = vld [vmem:[%s6283_s11 + $0x2b8] ss:$12 sps:$4 sm:$0xff]  }
 0x389   :  { %3137 = vmatpush1.bf16.msra.mxu1 %v5150_v55  ;;  %v5236_v55 = vld [vmem:[%s6283_s11 + $0x124] ss:$12 sps:$4 sm:$0xff]  }
 0x38a   :  { %3138 = vmatprep.subr.bf16.mxu1 %v5158_v56  ;;  %v5239_v56 = vld [vmem:[%s6283_s11 + $0x2a4] ss:$12 sps:$4 sm:$0xff]  }
 0x38d   :  { %3139 = vmatpush1.bf16.msra.mxu1 %v5156_v57  ;;  %v5234_v57 = vld [vmem:[%s6283_s11 + $0x120] ss:$12 sps:$4 sm:$0xff]  }
 0x38e   :  { %3140 = vmatprep.subr.bf16.mxu1 %v5164_v58  ;;  %v5237_v58 = vld [vmem:[%s6283_s11 + $0x2a0] ss:$12 sps:$4 sm:$0xff]  }
 0x391   :  { %3141 = vmatpush1.bf16.msra.mxu1 %v5162_v62  ;;  %v5245_v62 = vld [vmem:[%s6283_s11 + $0x28c] ss:$12 sps:$4 sm:$0xff]  }
 0x392   :  { %3873 = vmatprep.subr.bf16.mxu1 %v5170_v1  ;;  %v5243_v1 = vld [vmem:[%s6283_s11 + $0x288] ss:$12 sps:$4 sm:$0xff]  }
 0x434   :  { %v2904_v4 = vpop.f32.mrf.mxu1 }
 0x435   :  { %v2905_v53 = vadd.f32 %v4381_v3, %v2904_v4  ;;  %v5251_v3 = vld [vmem:[%s6283_s11 + $0x274] ss:$12 sps:$4 sm:$0xff]   ;;  %v5246_v4 = vld [vmem:[%s6283_s11 + $0xf0] ss:$12 sps:$4 sm:$0xff]  }
 0x436   :  { %v4647_v5 = vpop.f32.mrf.mxu1 }
 0x437   :  { %v2910_v6 = vmax.f32 %v2905_v53, 0.0  ;;  %v5249_v53 = vld [vmem:[%s6283_s11 + $0x270] ss:$12 sps:$4 sm:$0xff]  }
 0x438   :  { %v2907_v7 = vpop.f32.mrf.mxu1  ;;  %v5254_v5 = vld [vmem:[%s6283_s11 + $0xdc] ss:$12 sps:$4 sm:$0xff]  }
 0x439   :  { %v2911_v12 = vpack.c.bf16 %v2910_v6, %v2910_v6  ;;  %v5257_v6 = vld [vmem:[%s6283_s11 + $0x25c] ss:$12 sps:$4 sm:$0xff]   ;;  %v5252_v7 = vld [vmem:[%s6283_s11 + $0xd8] ss:$12 sps:$4 sm:$0xff]  }
 0x43a   :  { %v4648_v15 = vpop.f32.mrf.mxu1 }
 0x43b   :  { %3159 = vmatmul.mubr.bf16.vlgmr.msra.gmra.mxu1 %v2911_v12  ;;  %3200 = vmatmul.mubr.bf16.vlgmr.msra.gmra.mxu0 %v2911_v12  ;;  %v5263_v12 = vld [vmem:[%s6283_s11 + $0x244] ss:$12 sps:$4 sm:$0xff]  }
 0x43c   :  { %3874 = vmatpush1.bf16.msra.mxu1 %v5168_v8  ;;  %3915 = vmatpush1.bf16.msra.mxu0 %v5171_v10  ;;  %v5255_v8 = vld [vmem:[%s6283_s11 + $0x258] ss:$12 sps:$4 sm:$0xff]   ;;  %v5264_v15 = vld [vmem:[%s6283_s11 + $0x170] ss:$12 sps:$4 sm:$0xff]  }
 0x43d   :  { %3875 = vmatprep.subr.bf16.mxu1 %v5176_v13  ;;  %3916 = vmatprep.subr.bf16.mxu0 %v5179_v14  ;;  %v5260_v10 = vld [vmem:[%s6283_s11 + $0xc4] ss:$12 sps:$4 sm:$0xff]   ;;  %v5258_v13 = vld [vmem:[%s6283_s11 + $0xc0] ss:$12 sps:$4 sm:$0xff]  }
 0x43e   :  { %v5261_v14 = vld [vmem:[%s6283_s11 + $0x240] ss:$12 sps:$4 sm:$0xff]  }
 0x440   :  { %3876 = vmatpush1.bf16.msra.mxu1 %v5174_v16  ;;  %3917 = vmatpush1.bf16.msra.mxu0 %v5177_v17  ;;  %v5265_v16 = vld [vmem:[%s6283_s11 + $0x2f0] ss:$12 sps:$4 sm:$0xff]   ;;  %v2944_v17 = vld [vmem:[%s6282_s10] sm:$0xf] }
 0x441   :  { %3877 = vmatprep.subr.bf16.mxu1 %v5182_v18  ;;  %3918 = vmatprep.subr.bf16.mxu0 %v5185_v19  ;;  %v2949_v18 = vrot.slane %v2944_v17, %v5687_v30  ;;  %v2957_v19 = vrot.slane %v2944_v17, %v5719_v59 }
 0x444   :  { %3878 = vmatpush1.bf16.msra.mxu1 %v5180_v46  ;;  %3919 = vmatpush1.bf16.msra.mxu0 %v5183_v20  ;;  %v2953_v46 = vrot.slane %v2944_v17, %v5693_v32  ;;  %v2961_v20 = vrot.slane %v2944_v17, %v1882_v60  ;;  %v5267_v60 = vld [vmem:[%s6283_s11 + $0x230] ss:$12 sps:$4 sm:$0xff]  }
 0x445   :  { %3879 = vmatprep.subr.bf16.mxu1 %v5188_v21  ;;  %3920 = vmatprep.subr.bf16.mxu0 %v5191_v22 }
 0x448   :  { %3880 = vmatpush1.bf16.msra.mxu1 %v5186_v23  ;;  %3921 = vmatpush1.bf16.msra.mxu0 %v5189_v25 }
 0x449   :  { %3881 = vmatprep.subr.bf16.mxu1 %v5194_v26  ;;  %3922 = vmatprep.subr.bf16.mxu0 %v5197_v24 }
 0x44c   :  { %3882 = vmatpush1.bf16.msra.mxu1 %v5192_v27  ;;  %3923 = vmatpush1.bf16.msra.mxu0 %v5195_v28 }
 0x44d   :  { %3883 = vmatprep.subr.bf16.mxu1 %v5200_v31  ;;  %3924 = vmatprep.subr.bf16.mxu0 %v5203_v33 }
 0x450   :  { %3884 = vmatpush1.bf16.msra.mxu1 %v5198_v34  ;;  %3925 = vmatpush1.bf16.msra.mxu0 %v5201_v35 }
 0x451   :  { %3885 = vmatprep.subr.bf16.mxu1 %v5206_v36  ;;  %3926 = vmatprep.subr.bf16.mxu0 %v5209_v37 }
 0x454   :  { %3886 = vmatpush1.bf16.msra.mxu1 %v5204_v38  ;;  %3927 = vmatpush1.bf16.msra.mxu0 %v5207_v39 }
 0x455   :  { %3887 = vmatprep.subr.bf16.mxu1 %v5212_v40  ;;  %3928 = vmatprep.subr.bf16.mxu0 %v5215_v41 }
 0x458   :  { %3888 = vmatpush1.bf16.msra.mxu1 %v5210_v42  ;;  %3929 = vmatpush1.bf16.msra.mxu0 %v5213_v43 }
 0x459   :  { %3889 = vmatprep.subr.bf16.mxu1 %v5218_v44  ;;  %3930 = vmatprep.subr.bf16.mxu0 %v5221_v45  ;;  %v5268_v44 = vld [vmem:[%s6283_s11 + $0x158] ss:$12 sps:$4 sm:$0xff]  }
 0x45a   :  { %v5269_v45 = vld [vmem:[%s6283_s11 + $0x2d8] ss:$12 sps:$4 sm:$0xff]  }
 0x45c   :  { %3890 = vmatpush2.bf16.msra.mxu1 %v5216_v47  ;;  %3931 = vmatpush2.bf16.msra.mxu0 %v5219_v11  ;;  %v5270_v47 = vld [vmem:[%s6283_s11 + $0x98] ss:$12 sps:$4 sm:$0xff]  }
 0x45d   :  { %3891 = vmatprep.subr.bf16.mxu1 %v5224_v48  ;;  %3932 = vmatprep.subr.bf16.mxu0 %v5227_v49  ;;  %v5271_v11 = vld [vmem:[%s6283_s11 + $0x218] ss:$12 sps:$4 sm:$0xff]   ;;  %v5272_v48 = vld [vmem:[%s6283_s11 + $0x140] ss:$12 sps:$4 sm:$0xff]  }
 0x45e   :  { %v5273_v49 = vld [vmem:[%s6283_s11 + $0x2c0] ss:$12 sps:$4 sm:$0xff]  }
 0x460   :  { %3892 = vmatpush2.bf16.msra.mxu1 %v5222_v50  ;;  %3933 = vmatpush2.bf16.msra.mxu0 %v5225_v51  ;;  %v5274_v50 = vld [vmem:[%s6283_s11 + $0x80] ss:$12 sps:$4 sm:$0xff]  }
 0x461   :  { %3893 = vmatprep.subr.bf16.mxu1 %v5230_v0  ;;  %3934 = vmatprep.subr.bf16.mxu0 %v5233_v52  ;;  %v5275_v51 = vld [vmem:[%s6283_s11 + $0x200] ss:$12 sps:$4 sm:$0xff]   ;;  %v5276_v0 = vld [vmem:[%s6283_s11 + $0x128] ss:$12 sps:$4 sm:$0xff]  }
 0x462   :  { %v5277_v52 = vld [vmem:[%s6283_s11 + $0x2a8] ss:$12 sps:$4 sm:$0xff]  }
 0x464   :  { %3894 = vmatpush2.bf16.msra.mxu1 %v5228_v9  ;;  %3935 = vmatpush2.bf16.msra.mxu0 %v5231_v54  ;;  %v5278_v9 = vld [vmem:[%s6283_s11 + $0x68] ss:$12 sps:$4 sm:$0xff]  }
 0x465   :  { %3895 = vmatprep.subr.bf16.mxu1 %v5236_v55  ;;  %3936 = vmatprep.subr.bf16.mxu0 %v5239_v56  ;;  %v5279_v54 = vld [vmem:[%s6283_s11 + $0x1e8] ss:$12 sps:$4 sm:$0xff]   ;;  %v5280_v55 = vld [vmem:[%s6283_s11 + $0x110] ss:$12 sps:$4 sm:$0xff]  }
 0x466   :  { %v5281_v56 = vld [vmem:[%s6283_s11 + $0x290] ss:$12 sps:$4 sm:$0xff]  }
 0x468   :  { %3896 = vmatpush2.bf16.msra.mxu1 %v5234_v57  ;;  %3937 = vmatpush2.bf16.msra.mxu0 %v5237_v58  ;;  %v5282_v57 = vld [vmem:[%s6283_s11 + $0x50] ss:$12 sps:$4 sm:$0xff]  }
 0x469   :  { %3897 = vmatprep.subr.bf16.mxu1 %v5242_v61  ;;  %3938 = vmatprep.subr.bf16.mxu0 %v5245_v62  ;;  %v5283_v58 = vld [vmem:[%s6283_s11 + $0x1d0] ss:$12 sps:$4 sm:$0xff]   ;;  %v5284_v61 = vld [vmem:[%s6283_s11 + $0xf8] ss:$12 sps:$4 sm:$0xff]  }
 0x46a   :  { %v5285_v62 = vld [vmem:[%s6283_s11 + $0x278] ss:$12 sps:$4 sm:$0xff]  }
 0x46c   :  { %3898 = vmatpush2.bf16.msra.mxu1 %v5240_v63  ;;  %3939 = vmatpush2.bf16.msra.mxu0 %v5243_v1  ;;  %v5286_v63 = vld [vmem:[%s6283_s11 + $0x38] ss:$12 sps:$4 sm:$0xff]  }
 0x46d   :  { %3899 = vmatprep.subr.bf16.mxu1 %v5248_v2  ;;  %3940 = vmatprep.subr.bf16.mxu0 %v5251_v3  ;;  %v5287_v1 = vld [vmem:[%s6283_s11 + $0x1b8] ss:$12 sps:$4 sm:$0xff]   ;;  %v5288_v2 = vld [vmem:[%s6283_s11 + $0xe0] ss:$12 sps:$4 sm:$0xff]  }
 0x46e   :  { %v5289_v3 = vld [vmem:[%s6283_s11 + $0x260] ss:$12 sps:$4 sm:$0xff]  }
 0x470   :  { %3900 = vmatpush2.bf16.msra.mxu1 %v5246_v4  ;;  %3941 = vmatpush2.bf16.msra.mxu0 %v5249_v53  ;;  %v5290_v4 = vld [vmem:[%s6283_s11 + $0x20] ss:$12 sps:$4 sm:$0xff]  }
 0x471   :  { %3901 = vmatprep.subr.bf16.mxu1 %v5254_v5  ;;  %3942 = vmatprep.subr.bf16.mxu0 %v5257_v6  ;;  %v5291_v53 = vld [vmem:[%s6283_s11 + $0x1a0] ss:$12 sps:$4 sm:$0xff]   ;;  %v5292_v5 = vld [vmem:[%s6283_s11 + $0xc8] ss:$12 sps:$4 sm:$0xff]  }
 0x472   :  { %v5293_v6 = vld [vmem:[%s6283_s11 + $0x248] ss:$12 sps:$4 sm:$0xff]  }
 0x474   :  { %3902 = vmatpush2.bf16.msra.mxu1 %v5252_v7  ;;  %3943 = vmatpush2.bf16.msra.mxu0 %v5255_v8  ;;  %v5294_v7 = vld [vmem:[%s6283_s11 + $0x8] ss:$12 sps:$4 sm:$0xff]  }
 0x475   :  { %3903 = vmatprep.subr.bf16.mxu1 %v5260_v10  ;;  %3944 = vmatprep.subr.bf16.mxu0 %v5263_v12  ;;  %v5295_v8 = vld [vmem:[%s6283_s11 + $0x188] ss:$12 sps:$4 sm:$0xff]   ;;  %v3344_v10 = vld [vmem:[%s6284_s12] sm:$0x7]  ;;  %s5346_s11 = smov [#allocation5]  }
 0x476   :  { %v3349_v12 = vrot.slane %v3344_v10, %v5687_v30  ;;  %v3357_v30 = vrot.slane %v3344_v10, %v5719_v59  ;;  %s4044_s12 = sshll.u32 %s5346_s11, 4  ;;  %s4045_s12 = int_to_ptr.vmem [resolvable:$true] %s4044_s12 }
 0x477   :  { %s5316_s9 = scalar_lea.vmem %s4045_s12, 384  ;;  %p5321_p6 = scmp.lt.s32.totalorder %s4045_s12, %s4045_s12 }
 0x478   :  { %3904 = vmatpush2.bf16.msra.mxu1 %v5258_v13  ;;  %3945 = vmatpush2.bf16.msra.mxu0 %v5261_v14  ;;  %v3353_v13 = vrot.slane %v3344_v10, %v5693_v32  ;;  %p5317_p5 = scmp.ne.s32.totalorder %s4045_s12, %s5316_s9  ;;  %p5322_p7 = scmp.lt.s32.totalorder %s5316_s9, %s5316_s9 }
 0x479   :  { %4573 = vmatprep.subr.bf16.mxu1 %v5264_v15  ;;  %4595 = vmatprep.subr.bf16.mxu0 %v5265_v16 }
 0x47a   :  { %p5323_p8 = por %p5322_p7, %p5321_p6 }
 0x47c   :  { %p5324_p9 = pnand %p5323_p8, %p5317_p5 }
 0x4fb   :  { %v3160_v21 = vpop.f32.mrf.mxu1  ;;  %v3201_v22 = vpop.f32.mrf.mxu0 }
 0x4fc   :  { %v3161_v23 = vadd.f32 %v3160_v21, %v2949_v18  ;;  %v3202_v25 = vadd.f32 %v3201_v22, %v2957_v19 }
 0x4fd   :  { %v3162_v26 = vpop.f32.mrf.mxu1  ;;  %v3203_v24 = vpop.f32.mrf.mxu0 }
 0x4fe   :  { %v3163_v27 = vadd.f32 %v3162_v26, %v2953_v46  ;;  %v3204_v28 = vadd.f32 %v3203_v24, %v2961_v20  ;;  %v3208_v31 = vmax.f32 %v3161_v23, 0.0  ;;  %v3210_v33 = vmax.f32 %v3202_v25, 0.0 }
 0x4ff   :  { %v3164_v34 = vpop.f32.mrf.mxu1  ;;  %v3205_v35 = vpop.f32.mrf.mxu0 }
 0x500   :  { %v3209_v36 = vmax.f32 %v3163_v27, 0.0  ;;  %v3211_v37 = vmax.f32 %v3204_v28, 0.0  ;;  %v6170_v42 = vpack.c.bf16 %v3208_v31, %v3208_v31  ;;  %v6172_v43 = vpack.c.bf16 %v3210_v33, %v3210_v33 }
 0x501   :  { %v3165_v38 = vpop.f32.mrf.mxu1  ;;  %v3206_v39 = vpop.f32.mrf.mxu0 }
 0x502   :  { %v3213_v40 = vpack.c.bf16 %v3209_v36, %v3209_v36  ;;  %v3215_v41 = vpack.c.bf16 %v3211_v37, %v3211_v37 }
 0x504   :  { %3905 = vmatprep.mubr.bf16.mxu1 %v3213_v40  ;;  %3946 = vmatprep.mubr.bf16.mxu0 %v3215_v41 }
 0x505   :  { %3906 = vmatmul.mubr.bf16.vlgmr.msra.gmra.mxu1 %v6170_v42  ;;  %3947 = vmatmul.mubr.bf16.vlgmr.msra.gmra.mxu0 %v6172_v43 }
 0x506   :  { %4574 = vmatpush3.bf16.msra.mxu1 %v5266_v29  ;;  %4596 = vmatpush3.bf16.msra.mxu0 %v5267_v60 }
 0x507   :  { %3987 = vmatprep.mubr.bf16.mxu1 %v3213_v40  ;;  %4027 = vmatprep.mubr.bf16.mxu0 %v3215_v41 }
 0x508   :  { %4575 = vmatprep.subr.bf16.mxu1 %v5268_v44  ;;  %4597 = vmatprep.subr.bf16.mxu0 %v5269_v45 }
 0x50a   :  { %4576 = vmatpush3.bf16.msra.mxu1 %v5270_v47  ;;  %4598 = vmatpush3.bf16.msra.mxu0 %v5271_v11 }
 0x50b   :  { %4577 = vmatprep.subr.bf16.mxu1 %v5272_v48  ;;  %4599 = vmatprep.subr.bf16.mxu0 %v5273_v49 }
 0x50e   :  { %4578 = vmatpush3.bf16.msra.mxu1 %v5274_v50  ;;  %4600 = vmatpush3.bf16.msra.mxu0 %v5275_v51 }
 0x50f   :  { %4579 = vmatprep.subr.bf16.mxu1 %v5276_v0  ;;  %4601 = vmatprep.subr.bf16.mxu0 %v5277_v52 }
 0x512   :  { %4580 = vmatpush3.bf16.msra.mxu1 %v5278_v9  ;;  %4602 = vmatpush3.bf16.msra.mxu0 %v5279_v54 }
 0x513   :  { %4581 = vmatprep.subr.bf16.mxu1 %v5280_v55  ;;  %4603 = vmatprep.subr.bf16.mxu0 %v5281_v56 }
 0x516   :  { %4582 = vmatpush3.bf16.msra.mxu1 %v5282_v57  ;;  %4604 = vmatpush3.bf16.msra.mxu0 %v5283_v58 }
 0x517   :  { %4583 = vmatprep.subr.bf16.mxu1 %v5284_v61  ;;  %4605 = vmatprep.subr.bf16.mxu0 %v5285_v62 }
 0x51a   :  { %4584 = vmatpush3.bf16.msra.mxu1 %v5286_v63  ;;  %4606 = vmatpush3.bf16.msra.mxu0 %v5287_v1 }
 0x51b   :  { %4585 = vmatprep.subr.bf16.mxu1 %v5288_v2  ;;  %4607 = vmatprep.subr.bf16.mxu0 %v5289_v3 }
 0x51e   :  { %4586 = vmatpush3.bf16.msra.mxu1 %v5290_v4  ;;  %4608 = vmatpush3.bf16.msra.mxu0 %v5291_v53 }
 0x51f   :  { %4587 = vmatprep.subr.bf16.mxu1 %v5292_v5  ;;  %4609 = vmatprep.subr.bf16.mxu0 %v5293_v6 }
 0x522   :  { %4588 = vmatpush3.bf16.msra.mxu1 %v5294_v7  ;;  %4610 = vmatpush3.bf16.msra.mxu0 %v5295_v8 }
 0x525   :  { %3988 = vmatmul.mubr.bf16.vlgmr.msra.gmra.mxu1 %v6170_v42  ;;  %4028 = vmatmul.mubr.bf16.vlgmr.msra.gmra.mxu0 %v6172_v43 }
 0x5c5   :  { %v3907_v14 = vpop.f32.mrf.mxu1  ;;  %v3948_v15 = vpop.f32.mrf.mxu0 }
 0x5c6   :  { %v3908_v16 = vadd.f32 %v3907_v14, %v3349_v12 }
 0x5c7   :  { %v3909_v17 = vpop.f32.mrf.mxu1  ;;  %v3950_v18 = vpop.f32.mrf.mxu0 }
 0x5c8   :  { %v3949_v19 = vadd.f32 %v3948_v15, %v3908_v16  ;;  %v3910_v46 = vadd.f32 %v3909_v17, %v3353_v13 }
 0x5c9   :  { %v3911_v20 = vpop.f32.mrf.mxu1  ;;  %v3952_v21 = vpop.f32.mrf.mxu0 }
 0x5ca   :  { %4035 = vst [vmem:[#allocation5] sm:$0xff] %v3949_v19  ;;  %v3951_v22 = vadd.f32 %v3950_v18, %v3910_v46 }
 0x5cb   :  { %v3912_v23 = vpop.f32.mrf.mxu1  ;;  %v3953_v25 = vpop.f32.mrf.mxu0 }
 0x5cc   :  { %4036 = vst [vmem:[#allocation5 + $0x8] sm:$0xff] %v3951_v22 }
 0x5e5   :  { %v4589_v26 = vpop.f32.mrf.mxu1  ;;  %v4611_v24 = vpop.f32.mrf.mxu0 }
 0x5e7   :  { %v4590_v27 = vpop.f32.mrf.mxu1  ;;  %v4612_v32 = vpop.f32.mrf.mxu0 }
 0x5e8   :  { %v4591_v28 = vadd.f32 %v4590_v27, %v4589_v26  ;;  %v4613_v35 = vadd.f32 %v4612_v32, %v4611_v24 }
 0x5e9   :  { %v4592_v31 = vpop.f32.mrf.mxu1  ;;  %v4614_v33 = vpop.f32.mrf.mxu0 }
 0x5ea   :  { %v3990_v34 = vadd.f32 %v4591_v28, %v3357_v30 }
 0x5eb   :  { %v4593_v36 = vpop.f32.mrf.mxu1  ;;  %v4615_v37 = vpop.f32.mrf.mxu0 }
 0x5ec   :  { %v4030_v38 = vadd.f32 %v4613_v35, %v3990_v34 }
 0x5ee   :  { %4037 = vst.msk [vmem:[#allocation5 + $0x10] sm:$0xff] %vm1362_vm0, %v4030_v38 }
 0x5ef   :  { %5327 = shalt.err (!%p5324_p9)
}
 0x5f0   :  { %4047 = dma.vmem_to_hbm [thread:$0]  %s4045_s12, 384, %s6285_s13, [#allocation4]  }
 0x5f1   :  { %5338 = dma.done.wait [#allocation4], 384  }
 0x5f2   :  { %5339 = vsyncadd [#allocation4], 4294966912 }
 0x5f3   :  { %4051 = vsyncpa [#allocation3], 1 }
 0x5f4   :  { %4052 = vsyncpa [#allocation4], 1 }

</bundles_post_ra>
